<compile_context>
chip_gen: v5e
topology: v5e:2x2
jax: 0.10.0
libtpu: 0.0.40
codegen_flags: <defaults>
</compile_context>

<pallas_src>
import jax
import jax.numpy as jnp
from jax.experimental import pallas as pl
from jax.experimental.pallas import tpu as pltpu


# ----------------------------- kernels ------------------------------------ #

def make_encoder_kernel(E, H):
    """Grid axis = src time step; (h_out, c_out) carry the recurrence."""

    def kernel(x_ref, w_ref, b_ref, h_out, c_out, xh_sc):
        t = pl.program_id(0)

        @pl.when(t == 0)
        def _():
            xh_sc[...] = jnp.zeros(xh_sc.shape, xh_sc.dtype)   # h part := 0
            c_out[...] = jnp.zeros(c_out.shape, c_out.dtype)

        # place x into the [x | h] scratch (lane-aligned sub-write, no shuffle)
        xh_sc[:, 0:E] = x_ref[0]

        gates = (jnp.dot(xh_sc[...], w_ref[...],
                         preferred_element_type=jnp.float32) + b_ref[...])
        i = jax.nn.sigmoid(gates[:, 0 * H:1 * H])
        f = jax.nn.sigmoid(gates[:, 1 * H:2 * H])
        g = jnp.tanh(gates[:, 2 * H:3 * H])
        o = jax.nn.sigmoid(gates[:, 3 * H:4 * H])

        c_new = f * c_out[...] + i * g
        h_new = o * jnp.tanh(c_new)

        c_out[...] = c_new
        h_out[...] = h_new
        xh_sc[:, E:E + H] = h_new

    return kernel


def make_decoder_kernel(E, H, V):
    """Fused decode loop: grid axis = trg time step.

    Step 0 only initializes state (h/c from encoder, x = emb(trg[0])) and
    writes the zero row outputs[0].  Steps t >= 1 run LSTM cell + output
    Linear and write logits[t].  The next-step input is then selected with
    two flat pl.when branches: teacher forcing copies emb(trg[t]) (cheap),
    otherwise the greedy top-1 token is embedded in-kernel (argmax ->
    one-hot @ dec_emb on the MXU).  Both branches are skipped at the final
    step since that input is never used.
    """

    def kernel(tf_ref,                         # scalar prefetch [trg_len] i32
               trg_emb_ref,                    # [1, B, E] = emb(trg[t])
               h0_ref, c0_ref,                 # [B, H] encoder states
               w_ref, b_ref,                   # [E+H, 4H], [1, 4H]
               wout_ref, bout_ref,             # [H, V], [1, V]
               emb_ref,                        # [V, E] decoder embedding
               out_ref,                        # [1, B, V] logits at step t
               xh_sc, c_sc):                   # scratch [B,E+H], [B,H]
        t = pl.program_id(0)

        @pl.when(t == 0)
        def _():
            out_ref[...] = jnp.zeros(out_ref.shape, out_ref.dtype)  # outputs[0]
            xh_sc[:, 0:E] = trg_emb_ref[0]       # input = emb(trg[0])
            xh_sc[:, E:E + H] = h0_ref[...]
            c_sc[...] = c0_ref[...]

        @pl.when(t > 0)
        def _():
            # --- LSTM cell (merged matmul on [x | h]) ---
            gates = (jnp.dot(xh_sc[...], w_ref[...],
                             preferred_element_type=jnp.float32) + b_ref[...])
            i = jax.nn.sigmoid(gates[:, 0 * H:1 * H])
            f = jax.nn.sigmoid(gates[:, 1 * H:2 * H])
            g = jnp.tanh(gates[:, 2 * H:3 * H])
            o = jax.nn.sigmoid(gates[:, 3 * H:4 * H])
            c_new = f * c_sc[...] + i * g
            h_new = o * jnp.tanh(c_new)

            # --- output projection (logits[t]) ---
            logits = (jnp.dot(h_new, wout_ref[...],
                              preferred_element_type=jnp.float32)
                      + bout_ref[...])
            out_ref[0] = logits
            c_sc[...] = c_new
            xh_sc[:, E:E + H] = h_new

        # --- next-step input selection (flat branches, skipped at last t) ---
        not_last = (t + 1) < pl.num_programs(0)
        active = jnp.logical_and(t > 0, not_last)
        use_teacher = jnp.logical_and(active, tf_ref[t] != 0)
        use_greedy = jnp.logical_and(active, tf_ref[t] == 0)

        @pl.when(use_teacher)
        def _():
            xh_sc[:, 0:E] = trg_emb_ref[0]       # emb(trg[t]) precomputed

        @pl.when(use_greedy)
        def _():
            logits = out_ref[0]                  # re-read just-stored block
            row_max = jnp.max(logits, axis=1, keepdims=True)
            col = jax.lax.broadcasted_iota(jnp.int32, (logits.shape[0], V), 1)
            first_max = jnp.min(jnp.where(logits == row_max, col, V),
                                axis=1, keepdims=True)      # first argmax
            onehot = (col == first_max).astype(jnp.float32)
            xh_sc[:, 0:E] = jnp.dot(onehot, emb_ref[...],
                                    preferred_element_type=jnp.float32)

    return kernel


# ----------------------------- wrappers ------------------------------------ #

def run_encoder(x_emb, w, b):
    """x_emb: [src_len, B, E]; w: [E+H, 4H]; b: [1, 4H] -> (h, c) each [B, H]."""
    src_len, B, E = x_emb.shape
    H = w.shape[0] - E
    const = lambda t: (0, 0)
    return pl.pallas_call(
        make_encoder_kernel(E, H),
        out_shape=(jax.ShapeDtypeStruct((B, H), jnp.float32),
                   jax.ShapeDtypeStruct((B, H), jnp.float32)),
        grid_spec=pltpu.PrefetchScalarGridSpec(
            num_scalar_prefetch=0,
            grid=(src_len,),
            in_specs=[pl.BlockSpec((1, B, E), lambda t: (t, 0, 0)),
                      pl.BlockSpec((E + H, 4 * H), const),
                      pl.BlockSpec((1, 4 * H), const)],
            out_specs=(pl.BlockSpec((B, H), const),
                       pl.BlockSpec((B, H), const)),
            scratch_shapes=[pltpu.VMEM((B, E + H), jnp.float32)]),
        compiler_params=pltpu.CompilerParams(
            dimension_semantics=("arbitrary",)),   # time axis is a recurrence
    )(x_emb, w, b)


def run_decoder(tf_flags, trg_emb, h0, c0, w, b, wout, bout, dec_emb):
    """Fused decode loop. Returns logits [trg_len, B, V] (row 0 = zeros)."""
    trg_len, B, E = trg_emb.shape
    H = h0.shape[-1]
    V = wout.shape[-1]
    const = lambda t, tf: (0, 0)
    return pl.pallas_call(
        make_decoder_kernel(E, H, V),
        out_shape=jax.ShapeDtypeStruct((trg_len, B, V), jnp.float32),
        grid_spec=pltpu.PrefetchScalarGridSpec(
            num_scalar_prefetch=1,                 # tf_flags -> SMEM
            grid=(trg_len,),
            in_specs=[pl.BlockSpec((1, B, E), lambda t, tf: (t, 0, 0)),  # trg_emb
                      pl.BlockSpec((B, H), const),                       # h0
                      pl.BlockSpec((B, H), const),                       # c0
                      pl.BlockSpec((E + H, 4 * H), const),               # W
                      pl.BlockSpec((1, 4 * H), const),                   # b
                      pl.BlockSpec((H, V), const),                       # W_out
                      pl.BlockSpec((1, V), const),                       # b_out
                      pl.BlockSpec((dec_emb.shape[0], E), const)],       # emb
            out_specs=pl.BlockSpec((1, B, V), lambda t, tf: (t, 0, 0)),
            scratch_shapes=[pltpu.VMEM((B, E + H), jnp.float32),
                            pltpu.VMEM((B, H), jnp.float32)]),
        compiler_params=pltpu.CompilerParams(
            dimension_semantics=("arbitrary",)),   # time axis is a recurrence
    )(tf_flags, trg_emb, h0, c0, w, b, wout, bout, dec_emb)


def _seq2seq_forward(params, src, trg, rng_key, teacher_forcing_ratio=0.5):
    """Mirror of Seq2Seq.forward: returns [trg_len, batch, output_dim]."""
    # encoder (embedding gather once, outside the kernel)
    src_emb = jnp.take(params["enc_emb"], src, axis=0)        # [src_len, B, E]
    h, c = run_encoder(src_emb, params["enc_w"], params["enc_b"])

    # all teacher-forcing coin flips in one vectorized RNG call
    trg_len = trg.shape[0]
    tf_flags = (jax.random.uniform(rng_key, (trg_len,))
                < teacher_forcing_ratio).astype(jnp.int32)

    # teacher-token embeddings precomputed once; greedy top-1 embeddings are
    # looked up inside the fused decoder kernel (one-hot @ dec_emb).
    trg_emb = jnp.take(params["dec_emb"], trg, axis=0)        # [trg_len, B, E]

    return run_decoder(tf_flags, trg_emb, h, c,
                       params["dec_w"], params["dec_b"],
                       params["dec_wout"], params["dec_bout"],
                       params["dec_emb"])                     # [trg_len, B, V]


seq2seq_forward = jax.jit(_seq2seq_forward)


# ----------------------------- params / main -------------------------------- #

def init_params(key, src_vocab, trg_vocab, emb_dim, hid_dim):
    ks = jax.random.split(key, 8)
    s = 0.1

    def normal(k, shape):
        return s * jax.random.normal(k, shape, jnp.float32)

    # NOTE: combined W = [W_ih^T ; W_hh^T] (gate order i,f,g,o); combined bias
    # must equal b_ih + b_hh when porting trained PyTorch nn.LSTM weights.
    return {
        "enc_emb":  normal(ks[0], (src_vocab, emb_dim)),
        "enc_w":    normal(ks[1], (emb_dim + hid_dim, 4 * hid_dim)),
        "enc_b":    normal(ks[2], (1, 4 * hid_dim)),
        "dec_emb":  normal(ks[3], (trg_vocab, emb_dim)),
        "dec_w":    normal(ks[4], (emb_dim + hid_dim, 4 * hid_dim)),
        "dec_b":    normal(ks[5], (1, 4 * hid_dim)),
        "dec_wout": normal(ks[6], (hid_dim, trg_vocab)),
        "dec_bout": normal(ks[7], (1, trg_vocab)),
    }


if __name__ == "__main__":
    # (8,128)-aligned demo shapes: B multiple of 8 (sublanes), E/H/V multiples
    # of 128 (lanes) -> unmasked stores, lane-aligned gate slices, full MXU tiles.
    SRC_LEN, TRG_LEN, BATCH = 8, 8, 8
    SRC_VOCAB, TRG_VOCAB = 128, 128
    EMB_DIM, HID_DIM = 128, 128

    key = jax.random.PRNGKey(0)
    k_params, k_src, k_trg, k_tf = jax.random.split(key, 4)

    params = init_params(k_params, SRC_VOCAB, TRG_VOCAB, EMB_DIM, HID_DIM)
    src = jax.random.randint(k_src, (SRC_LEN, BATCH), 0, SRC_VOCAB, jnp.int32)
    trg = jax.random.randint(k_trg, (TRG_LEN, BATCH), 0, TRG_VOCAB, jnp.int32)

    out = seq2seq_forward(params, src, trg, k_tf, 0.5)
    out = jax.block_until_ready(out)
    assert out.shape == (TRG_LEN, BATCH, TRG_VOCAB), out.shape
    assert bool(jnp.all(jnp.isfinite(out)))
    print("KERNEL_OK")
</pallas_src>

<mosaic_0001>
module attributes {stable_mosaic.version = 11 : i64} {
  func.func @kernel(%arg0: i32, %arg1: memref<1x8x128xf32, #tpu.memory_space<vmem>>, %arg2: memref<256x512xf32, #tpu.memory_space<vmem>>, %arg3: memref<1x512xf32, #tpu.memory_space<vmem>>, %arg4: memref<8x128xf32, #tpu.memory_space<vmem>>, %arg5: memref<8x128xf32, #tpu.memory_space<vmem>>, %arg6: memref<8x256xf32, #tpu.memory_space<vmem>>) attributes {dimension_semantics = [#tpu.dimension_semantics<arbitrary>], iteration_bounds = array<i64: 8>, scalar_prefetch = 0 : i64, scratch_operands = 1 : i64, tpu.core_type = #tpu.core_type<tc>, window_params = [{transform_indices = @transform_0, window_bounds = array<i64: 1, 8, 128>}, {pipeline_mode = #tpu.pipeline_mode<synchronous>, transform_indices = @transform_1, window_bounds = array<i64: 256, 512>}, {pipeline_mode = #tpu.pipeline_mode<synchronous>, transform_indices = @transform_2, window_bounds = array<i64: 1, 512>}, {pipeline_mode = #tpu.pipeline_mode<synchronous>, transform_indices = @transform_3, window_bounds = array<i64: 8, 128>}, {pipeline_mode = #tpu.pipeline_mode<synchronous>, transform_indices = @transform_4, window_bounds = array<i64: 8, 128>}]} {
    %c0_i32 = arith.constant 0 : i32
    %0 = arith.cmpi eq, %arg0, %c0_i32 : i32
    %1 = arith.extui %0 : i1 to i32
    %c0_i32_0 = arith.constant 0 : i32
    %2 = arith.cmpi ne, %1, %c0_i32_0 : i32
    scf.if %2 {
      %cst_21 = arith.constant 0.000000e+00 : f32
      %41 = vector.broadcast %cst_21 : f32 to vector<8x256xf32>
      %c0_22 = arith.constant 0 : index
      %c0_23 = arith.constant 0 : index
      %42 = vector.load %arg6[%c0_22, %c0_23] : memref<8x256xf32, #tpu.memory_space<vmem>>, vector<8x256xf32>
      tpu.vector_store %arg6[%c0_22, %c0_23], %41 {strides = array<i32>} : memref<8x256xf32, #tpu.memory_space<vmem>>, vector<8x256xf32>,
      %cst_24 = arith.constant 0.000000e+00 : f32
      %43 = vector.broadcast %cst_24 : f32 to vector<8x128xf32>
      %c0_25 = arith.constant 0 : index
      %c0_26 = arith.constant 0 : index
      %44 = vector.load %arg5[%c0_25, %c0_26] : memref<8x128xf32, #tpu.memory_space<vmem>>, vector<8x128xf32>
      tpu.vector_store %arg5[%c0_25, %c0_26], %43 {strides = array<i32>} : memref<8x128xf32, #tpu.memory_space<vmem>>, vector<8x128xf32>,
    } else {
    }
    %c0 = arith.constant 0 : index
    %c0_1 = arith.constant 0 : index
    %c0_2 = arith.constant 0 : index
    %3 = vector.load %arg1[%c0, %c0_1, %c0_2] : memref<1x8x128xf32, #tpu.memory_space<vmem>>, vector<1x8x128xf32>
    %4 = vector.shape_cast %3 : vector<1x8x128xf32> to vector<8x128xf32>
    %c0_3 = arith.constant 0 : index
    %c0_4 = arith.constant 0 : index
    %5 = vector.load %arg6[%c0_3, %c0_4] : memref<8x256xf32, #tpu.memory_space<vmem>>, vector<8x128xf32>
    tpu.vector_store %arg6[%c0_3, %c0_4], %4 {strides = array<i32>} : memref<8x256xf32, #tpu.memory_space<vmem>>, vector<8x128xf32>,
    %c0_5 = arith.constant 0 : index
    %c0_6 = arith.constant 0 : index
    %6 = vector.load %arg6[%c0_5, %c0_6] : memref<8x256xf32, #tpu.memory_space<vmem>>, vector<8x256xf32>
    %c0_7 = arith.constant 0 : index
    %c0_8 = arith.constant 0 : index
    %7 = vector.load %arg2[%c0_7, %c0_8] : memref<256x512xf32, #tpu.memory_space<vmem>>, vector<256x512xf32>
    %cst = arith.constant dense<0.000000e+00> : vector<8x512xf32>
    %8 = tpu.matmul %6, %7, %cst {dimension_numbers = #tpu.dot_dimension_numbers<[1], [0], [0], [1], [0, 0, 1, 1], [], []>} : vector<8x256xf32>, vector<256x512xf32>, vector<8x512xf32> -> vector<8x512xf32>
    %c0_9 = arith.constant 0 : index
    %c0_10 = arith.constant 0 : index
    %9 = vector.load %arg3[%c0_9, %c0_10] : memref<1x512xf32, #tpu.memory_space<vmem>>, vector<1x512xf32>
    %10 = vector.broadcast %9 : vector<1x512xf32> to vector<8x512xf32>
    %11 = arith.addf %8, %10 : vector<8x512xf32>
    %12 = vector.extract_strided_slice %11 {offsets = [0, 0], sizes = [8, 128], strides = [1, 1]} : vector<8x512xf32> to vector<8x128xf32>
    %13 = arith.negf %12 : vector<8x128xf32>
    %14 = math.exp %13 : vector<8x128xf32>
    %cst_11 = arith.constant 1.000000e+00 : f32
    %15 = vector.broadcast %cst_11 : f32 to vector<8x128xf32>
    %16 = arith.addf %15, %14 : vector<8x128xf32>
    %17 = arith.divf %15, %16 : vector<8x128xf32>
    %18 = vector.extract_strided_slice %11 {offsets = [0, 128], sizes = [8, 128], strides = [1, 1]} : vector<8x512xf32> to vector<8x128xf32>
    %19 = arith.negf %18 : vector<8x128xf32>
    %20 = math.exp %19 : vector<8x128xf32>
    %cst_12 = arith.constant 1.000000e+00 : f32
    %21 = vector.broadcast %cst_12 : f32 to vector<8x128xf32>
    %22 = arith.addf %21, %20 : vector<8x128xf32>
    %23 = arith.divf %21, %22 : vector<8x128xf32>
    %24 = vector.extract_strided_slice %11 {offsets = [0, 256], sizes = [8, 128], strides = [1, 1]} : vector<8x512xf32> to vector<8x128xf32>
    %25 = math.tanh %24 : vector<8x128xf32>
    %26 = vector.extract_strided_slice %11 {offsets = [0, 384], sizes = [8, 128], strides = [1, 1]} : vector<8x512xf32> to vector<8x128xf32>
    %27 = arith.negf %26 : vector<8x128xf32>
    %28 = math.exp %27 : vector<8x128xf32>
    %cst_13 = arith.constant 1.000000e+00 : f32
    %29 = vector.broadcast %cst_13 : f32 to vector<8x128xf32>
    %30 = arith.addf %29, %28 : vector<8x128xf32>
    %31 = arith.divf %29, %30 : vector<8x128xf32>
    %c0_14 = arith.constant 0 : index
    %c0_15 = arith.constant 0 : index
    %32 = vector.load %arg5[%c0_14, %c0_15] : memref<8x128xf32, #tpu.memory_space<vmem>>, vector<8x128xf32>
    %33 = arith.mulf %23, %32 : vector<8x128xf32>
    %34 = arith.mulf %17, %25 : vector<8x128xf32>
    %35 = arith.addf %33, %34 : vector<8x128xf32>
    %36 = math.tanh %35 : vector<8x128xf32>
    %37 = arith.mulf %31, %36 : vector<8x128xf32>
    %c0_16 = arith.constant 0 : index
    %c0_17 = arith.constant 0 : index
    %38 = vector.load %arg5[%c0_16, %c0_17] : memref<8x128xf32, #tpu.memory_space<vmem>>, vector<8x128xf32>
    tpu.vector_store %arg5[%c0_16, %c0_17], %35 {strides = array<i32>} : memref<8x128xf32, #tpu.memory_space<vmem>>, vector<8x128xf32>,
    %c0_18 = arith.constant 0 : index
    %c0_19 = arith.constant 0 : index
    %39 = vector.load %arg4[%c0_18, %c0_19] : memref<8x128xf32, #tpu.memory_space<vmem>>, vector<8x128xf32>
    tpu.vector_store %arg4[%c0_18, %c0_19], %37 {strides = array<i32>} : memref<8x128xf32, #tpu.memory_space<vmem>>, vector<8x128xf32>,
    %c0_20 = arith.constant 0 : index
    %c128 = arith.constant 128 : index
    %40 = vector.load %arg6[%c0_20, %c128] : memref<8x256xf32, #tpu.memory_space<vmem>>, vector<8x128xf32>
    tpu.vector_store %arg6[%c0_20, %c128], %37 {strides = array<i32>} : memref<8x256xf32, #tpu.memory_space<vmem>>, vector<8x128xf32>,
    return
  }
  func.func @transform_0(%arg0: i32) -> (i32, i32, i32) {
    %c0_i32 = arith.constant 0 : i32
    %c0_i32_0 = arith.constant 0 : i32
    %c0_i32_1 = arith.constant 0 : i32
    return %arg0, %c0_i32, %c0_i32_0 : i32, i32, i32
  }
  func.func @transform_1(%arg0: i32) -> (i32, i32) {
    %c0_i32 = arith.constant 0 : i32
    %c0_i32_0 = arith.constant 0 : i32
    %c0_i32_1 = arith.constant 0 : i32
    return %c0_i32, %c0_i32_0 : i32, i32
  }
  func.func @transform_2(%arg0: i32) -> (i32, i32) {
    %c0_i32 = arith.constant 0 : i32
    %c0_i32_0 = arith.constant 0 : i32
    %c0_i32_1 = arith.constant 0 : i32
    return %c0_i32, %c0_i32_0 : i32, i32
  }
  func.func @transform_3(%arg0: i32) -> (i32, i32) {
    %c0_i32 = arith.constant 0 : i32
    %c0_i32_0 = arith.constant 0 : i32
    %c0_i32_1 = arith.constant 0 : i32
    return %c0_i32, %c0_i32_0 : i32, i32
  }
  func.func @transform_4(%arg0: i32) -> (i32, i32) {
    %c0_i32 = arith.constant 0 : i32
    %c0_i32_0 = arith.constant 0 : i32
    %c0_i32_1 = arith.constant 0 : i32
    return %c0_i32, %c0_i32_0 : i32, i32
  }
}

module attributes {stable_mosaic.version = 11 : i64} {
  func.func @kernel(%arg0: i32, %arg1: memref<8xi32, #tpu.memory_space<smem>>, %arg2: memref<1x8x128xf32, #tpu.memory_space<vmem>>, %arg3: memref<8x128xf32, #tpu.memory_space<vmem>>, %arg4: memref<8x128xf32, #tpu.memory_space<vmem>>, %arg5: memref<256x512xf32, #tpu.memory_space<vmem>>, %arg6: memref<1x512xf32, #tpu.memory_space<vmem>>, %arg7: memref<128x128xf32, #tpu.memory_space<vmem>>, %arg8: memref<1x128xf32, #tpu.memory_space<vmem>>, %arg9: memref<128x128xf32, #tpu.memory_space<vmem>>, %arg10: memref<1x8x128xf32, #tpu.memory_space<vmem>>, %arg11: memref<8x256xf32, #tpu.memory_space<vmem>>, %arg12: memref<8x128xf32, #tpu.memory_space<vmem>>) attributes {dimension_semantics = [#tpu.dimension_semantics<arbitrary>], iteration_bounds = array<i64: 8>, scalar_prefetch = 1 : i64, scratch_operands = 2 : i64, tpu.core_type = #tpu.core_type<tc>, window_params = [{transform_indices = @transform_0, window_bounds = array<i64: 1, 8, 128>}, {pipeline_mode = #tpu.pipeline_mode<synchronous>, transform_indices = @transform_1, window_bounds = array<i64: 8, 128>}, {pipeline_mode = #tpu.pipeline_mode<synchronous>, transform_indices = @transform_2, window_bounds = array<i64: 8, 128>}, {pipeline_mode = #tpu.pipeline_mode<synchronous>, transform_indices = @transform_3, window_bounds = array<i64: 256, 512>}, {pipeline_mode = #tpu.pipeline_mode<synchronous>, transform_indices = @transform_4, window_bounds = array<i64: 1, 512>}, {pipeline_mode = #tpu.pipeline_mode<synchronous>, transform_indices = @transform_5, window_bounds = array<i64: 128, 128>}, {pipeline_mode = #tpu.pipeline_mode<synchronous>, transform_indices = @transform_6, window_bounds = array<i64: 1, 128>}, {pipeline_mode = #tpu.pipeline_mode<synchronous>, transform_indices = @transform_7, window_bounds = array<i64: 128, 128>}, {transform_indices = @transform_8, window_bounds = array<i64: 1, 8, 128>}]} {
    %c0_i32 = arith.constant 0 : i32
    %0 = arith.cmpi eq, %arg0, %c0_i32 : i32
    %1 = arith.extui %0 : i1 to i32
    %c0_i32_0 = arith.constant 0 : i32
    %2 = arith.cmpi ne, %1, %c0_i32_0 : i32
    scf.if %2 {
      %cst = arith.constant 0.000000e+00 : f32
      %22 = vector.broadcast %cst : f32 to vector<1x8x128xf32>
      %c0 = arith.constant 0 : index
      %c0_8 = arith.constant 0 : index
      %c0_9 = arith.constant 0 : index
      %23 = vector.load %arg10[%c0, %c0_8, %c0_9] : memref<1x8x128xf32, #tpu.memory_space<vmem>>, vector<1x8x128xf32>
      tpu.vector_store %arg10[%c0, %c0_8, %c0_9], %22 {strides = array<i32>} : memref<1x8x128xf32, #tpu.memory_space<vmem>>, vector<1x8x128xf32>,
      %c0_10 = arith.constant 0 : index
      %c0_11 = arith.constant 0 : index
      %c0_12 = arith.constant 0 : index
      %24 = vector.load %arg2[%c0_10, %c0_11, %c0_12] : memref<1x8x128xf32, #tpu.memory_space<vmem>>, vector<1x8x128xf32>
      %25 = vector.shape_cast %24 : vector<1x8x128xf32> to vector<8x128xf32>
      %c0_13 = arith.constant 0 : index
      %c0_14 = arith.constant 0 : index
      %26 = vector.load %arg11[%c0_13, %c0_14] : memref<8x256xf32, #tpu.memory_space<vmem>>, vector<8x128xf32>
      tpu.vector_store %arg11[%c0_13, %c0_14], %25 {strides = array<i32>} : memref<8x256xf32, #tpu.memory_space<vmem>>, vector<8x128xf32>,
      %c0_15 = arith.constant 0 : index
      %c0_16 = arith.constant 0 : index
      %27 = vector.load %arg3[%c0_15, %c0_16] : memref<8x128xf32, #tpu.memory_space<vmem>>, vector<8x128xf32>
      %c0_17 = arith.constant 0 : index
      %c128 = arith.constant 128 : index
      %28 = vector.load %arg11[%c0_17, %c128] : memref<8x256xf32, #tpu.memory_space<vmem>>, vector<8x128xf32>
      tpu.vector_store %arg11[%c0_17, %c128], %27 {strides = array<i32>} : memref<8x256xf32, #tpu.memory_space<vmem>>, vector<8x128xf32>,
      %c0_18 = arith.constant 0 : index
      %c0_19 = arith.constant 0 : index
      %29 = vector.load %arg4[%c0_18, %c0_19] : memref<8x128xf32, #tpu.memory_space<vmem>>, vector<8x128xf32>
      %c0_20 = arith.constant 0 : index
      %c0_21 = arith.constant 0 : index
      %30 = vector.load %arg12[%c0_20, %c0_21] : memref<8x128xf32, #tpu.memory_space<vmem>>, vector<8x128xf32>
      tpu.vector_store %arg12[%c0_20, %c0_21], %29 {strides = array<i32>} : memref<8x128xf32, #tpu.memory_space<vmem>>, vector<8x128xf32>,
    } else {
    }
    %c0_i32_1 = arith.constant 0 : i32
    %3 = arith.cmpi sgt, %arg0, %c0_i32_1 : i32
    %4 = arith.extui %3 : i1 to i32
    %c0_i32_2 = arith.constant 0 : i32
    %5 = arith.cmpi ne, %4, %c0_i32_2 : i32
    scf.if %5 {
      %c0 = arith.constant 0 : index
      %c0_8 = arith.constant 0 : index
      %22 = vector.load %arg11[%c0, %c0_8] : memref<8x256xf32, #tpu.memory_space<vmem>>, vector<8x256xf32>
      %c0_9 = arith.constant 0 : index
      %c0_10 = arith.constant 0 : index
      %23 = vector.load %arg5[%c0_9, %c0_10] : memref<256x512xf32, #tpu.memory_space<vmem>>, vector<256x512xf32>
      %cst = arith.constant dense<0.000000e+00> : vector<8x512xf32>
      %24 = tpu.matmul %22, %23, %cst {dimension_numbers = #tpu.dot_dimension_numbers<[1], [0], [0], [1], [0, 0, 1, 1], [], []>} : vector<8x256xf32>, vector<256x512xf32>, vector<8x512xf32> -> vector<8x512xf32>
      %c0_11 = arith.constant 0 : index
      %c0_12 = arith.constant 0 : index
      %25 = vector.load %arg6[%c0_11, %c0_12] : memref<1x512xf32, #tpu.memory_space<vmem>>, vector<1x512xf32>
      %26 = vector.broadcast %25 : vector<1x512xf32> to vector<8x512xf32>
      %27 = arith.addf %24, %26 : vector<8x512xf32>
      %28 = vector.extract_strided_slice %27 {offsets = [0, 0], sizes = [8, 128], strides = [1, 1]} : vector<8x512xf32> to vector<8x128xf32>
      %29 = arith.negf %28 : vector<8x128xf32>
      %30 = math.exp %29 : vector<8x128xf32>
      %cst_13 = arith.constant 1.000000e+00 : f32
      %31 = vector.broadcast %cst_13 : f32 to vector<8x128xf32>
      %32 = arith.addf %31, %30 : vector<8x128xf32>
      %33 = arith.divf %31, %32 : vector<8x128xf32>
      %34 = vector.extract_strided_slice %27 {offsets = [0, 128], sizes = [8, 128], strides = [1, 1]} : vector<8x512xf32> to vector<8x128xf32>
      %35 = arith.negf %34 : vector<8x128xf32>
      %36 = math.exp %35 : vector<8x128xf32>
      %cst_14 = arith.constant 1.000000e+00 : f32
      %37 = vector.broadcast %cst_14 : f32 to vector<8x128xf32>
      %38 = arith.addf %37, %36 : vector<8x128xf32>
      %39 = arith.divf %37, %38 : vector<8x128xf32>
      %40 = vector.extract_strided_slice %27 {offsets = [0, 256], sizes = [8, 128], strides = [1, 1]} : vector<8x512xf32> to vector<8x128xf32>
      %41 = math.tanh %40 : vector<8x128xf32>
      %42 = vector.extract_strided_slice %27 {offsets = [0, 384], sizes = [8, 128], strides = [1, 1]} : vector<8x512xf32> to vector<8x128xf32>
      %43 = arith.negf %42 : vector<8x128xf32>
      %44 = math.exp %43 : vector<8x128xf32>
      %cst_15 = arith.constant 1.000000e+00 : f32
      %45 = vector.broadcast %cst_15 : f32 to vector<8x128xf32>
      %46 = arith.addf %45, %44 : vector<8x128xf32>
      %47 = arith.divf %45, %46 : vector<8x128xf32>
      %c0_16 = arith.constant 0 : index
      %c0_17 = arith.constant 0 : index
      %48 = vector.load %arg12[%c0_16, %c0_17] : memref<8x128xf32, #tpu.memory_space<vmem>>, vector<8x128xf32>
      %49 = arith.mulf %39, %48 : vector<8x128xf32>
      %50 = arith.mulf %33, %41 : vector<8x128xf32>
      %51 = arith.addf %49, %50 : vector<8x128xf32>
      %52 = math.tanh %51 : vector<8x128xf32>
      %53 = arith.mulf %47, %52 : vector<8x128xf32>
      %c0_18 = arith.constant 0 : index
      %c0_19 = arith.constant 0 : index
      %54 = vector.load %arg7[%c0_18, %c0_19] : memref<128x128xf32, #tpu.memory_space<vmem>>, vector<128x128xf32>
      %cst_20 = arith.constant dense<0.000000e+00> : vector<8x128xf32>
      %55 = tpu.matmul %53, %54, %cst_20 {dimension_numbers = #tpu.dot_dimension_numbers<[1], [0], [0], [1], [0, 0, 1, 1], [], []>} : vector<8x128xf32>, vector<128x128xf32>, vector<8x128xf32> -> vector<8x128xf32>
      %c0_21 = arith.constant 0 : index
      %c0_22 = arith.constant 0 : index
      %56 = vector.load %arg8[%c0_21, %c0_22] : memref<1x128xf32, #tpu.memory_space<vmem>>, vector<1x128xf32>
      %57 = vector.broadcast %56 : vector<1x128xf32> to vector<8x128xf32>
      %58 = arith.addf %55, %57 : vector<8x128xf32>
      %c0_23 = arith.constant 0 : index
      %c0_24 = arith.constant 0 : index
      %c0_25 = arith.constant 0 : index
      %59 = vector.load %arg10[%c0_23, %c0_24, %c0_25] : memref<1x8x128xf32, #tpu.memory_space<vmem>>, vector<1x8x128xf32>
      %60 = vector.shape_cast %59 : vector<1x8x128xf32> to vector<8x128xf32>
      %61 = vector.shape_cast %58 : vector<8x128xf32> to vector<1x8x128xf32>
      tpu.vector_store %arg10[%c0_23, %c0_24, %c0_25], %61 {strides = array<i32>} : memref<1x8x128xf32, #tpu.memory_space<vmem>>, vector<1x8x128xf32>,
      %c0_26 = arith.constant 0 : index
      %c0_27 = arith.constant 0 : index
      %62 = vector.load %arg12[%c0_26, %c0_27] : memref<8x128xf32, #tpu.memory_space<vmem>>, vector<8x128xf32>
      tpu.vector_store %arg12[%c0_26, %c0_27], %51 {strides = array<i32>} : memref<8x128xf32, #tpu.memory_space<vmem>>, vector<8x128xf32>,
      %c0_28 = arith.constant 0 : index
      %c128 = arith.constant 128 : index
      %63 = vector.load %arg11[%c0_28, %c128] : memref<8x256xf32, #tpu.memory_space<vmem>>, vector<8x128xf32>
      tpu.vector_store %arg11[%c0_28, %c128], %53 {strides = array<i32>} : memref<8x256xf32, #tpu.memory_space<vmem>>, vector<8x128xf32>,
    } else {
    }
    %c1_i32 = arith.constant 1 : i32
    %6 = arith.addi %arg0, %c1_i32 : i32
    %c8_i32 = arith.constant 8 : i32
    %7 = arith.cmpi slt, %6, %c8_i32 : i32
    %c0_i32_3 = arith.constant 0 : i32
    %8 = arith.cmpi sgt, %arg0, %c0_i32_3 : i32
    %9 = arith.andi %8, %7 : i1
    %10 = arith.index_cast %arg0 : i32 to index
    %11 = memref.load %arg1[%10] : memref<8xi32, #tpu.memory_space<smem>>
    %c0_i32_4 = arith.constant 0 : i32
    %12 = arith.cmpi ne, %11, %c0_i32_4 : i32
    %13 = arith.andi %9, %12 : i1
    %14 = arith.index_cast %arg0 : i32 to index
    %15 = memref.load %arg1[%14] : memref<8xi32, #tpu.memory_space<smem>>
    %c0_i32_5 = arith.constant 0 : i32
    %16 = arith.cmpi eq, %15, %c0_i32_5 : i32
    %17 = arith.andi %9, %16 : i1
    %18 = arith.extui %13 : i1 to i32
    %c0_i32_6 = arith.constant 0 : i32
    %19 = arith.cmpi ne, %18, %c0_i32_6 : i32
    scf.if %19 {
      %c0 = arith.constant 0 : index
      %c0_8 = arith.constant 0 : index
      %c0_9 = arith.constant 0 : index
      %22 = vector.load %arg2[%c0, %c0_8, %c0_9] : memref<1x8x128xf32, #tpu.memory_space<vmem>>, vector<1x8x128xf32>
      %23 = vector.shape_cast %22 : vector<1x8x128xf32> to vector<8x128xf32>
      %c0_10 = arith.constant 0 : index
      %c0_11 = arith.constant 0 : index
      %24 = vector.load %arg11[%c0_10, %c0_11] : memref<8x256xf32, #tpu.memory_space<vmem>>, vector<8x128xf32>
      tpu.vector_store %arg11[%c0_10, %c0_11], %23 {strides = array<i32>} : memref<8x256xf32, #tpu.memory_space<vmem>>, vector<8x128xf32>,
    } else {
    }
    %20 = arith.extui %17 : i1 to i32
    %c0_i32_7 = arith.constant 0 : i32
    %21 = arith.cmpi ne, %20, %c0_i32_7 : i32
    scf.if %21 {
      %c0 = arith.constant 0 : index
      %c0_8 = arith.constant 0 : index
      %c0_9 = arith.constant 0 : index
      %22 = vector.load %arg10[%c0, %c0_8, %c0_9] : memref<1x8x128xf32, #tpu.memory_space<vmem>>, vector<1x8x128xf32>
      %23 = vector.shape_cast %22 : vector<1x8x128xf32> to vector<8x128xf32>
      %cst = arith.constant dense<0xFF800000> : vector<8xf32>
      %24 = vector.multi_reduction <maximumf>, %23, %cst [1] : vector<8x128xf32> to vector<8xf32>
      %25 = vector.shape_cast %24 : vector<8xf32> to vector<8x1xf32>
      %26 = tpu.iota {dimensions = array<i32: 1>} : vector<8x128xi32>
      %27 = vector.broadcast %25 : vector<8x1xf32> to vector<8x128xf32>
      %28 = arith.cmpf oeq, %23, %27 : vector<8x128xf32>
      %c128_i32 = arith.constant 128 : i32
      %29 = vector.broadcast %c128_i32 : i32 to vector<8x128xi32>
      %30 = arith.select %28, %26, %29 : vector<8x128xi1>, vector<8x128xi32>
      %cst_10 = arith.constant dense<2147483647> : vector<8xi32>
      %31 = vector.multi_reduction <minsi>, %30, %cst_10 [1] : vector<8x128xi32> to vector<8xi32>
      %32 = vector.shape_cast %31 : vector<8xi32> to vector<8x1xi32>
      %33 = vector.broadcast %32 : vector<8x1xi32> to vector<8x128xi32>
      %34 = arith.cmpi eq, %26, %33 : vector<8x128xi32>
      %35 = arith.extui %34 : vector<8x128xi1> to vector<8x128xi32>
      %36 = arith.sitofp %35 : vector<8x128xi32> to vector<8x128xf32>
      %c0_11 = arith.constant 0 : index
      %c0_12 = arith.constant 0 : index
      %37 = vector.load %arg9[%c0_11, %c0_12] : memref<128x128xf32, #tpu.memory_space<vmem>>, vector<128x128xf32>
      %cst_13 = arith.constant dense<0.000000e+00> : vector<8x128xf32>
      %38 = tpu.matmul %36, %37, %cst_13 {dimension_numbers = #tpu.dot_dimension_numbers<[1], [0], [0], [1], [0, 0, 1, 1], [], []>} : vector<8x128xf32>, vector<128x128xf32>, vector<8x128xf32> -> vector<8x128xf32>
      %c0_14 = arith.constant 0 : index
      %c0_15 = arith.constant 0 : index
      %39 = vector.load %arg11[%c0_14, %c0_15] : memref<8x256xf32, #tpu.memory_space<vmem>>, vector<8x128xf32>
      tpu.vector_store %arg11[%c0_14, %c0_15], %38 {strides = array<i32>} : memref<8x256xf32, #tpu.memory_space<vmem>>, vector<8x128xf32>,
    } else {
    }
    return
  }
  func.func @transform_0(%arg0: i32, %arg1: memref<8xi32, #tpu.memory_space<smem>>) -> (i32, i32, i32) {
    %c0_i32 = arith.constant 0 : i32
    %c0_i32_0 = arith.constant 0 : i32
    %c0_i32_1 = arith.constant 0 : i32
    return %arg0, %c0_i32, %c0_i32_0 : i32, i32, i32
  }
  func.func @transform_1(%arg0: i32, %arg1: memref<8xi32, #tpu.memory_space<smem>>) -> (i32, i32) {
    %c0_i32 = arith.constant 0 : i32
    %c0_i32_0 = arith.constant 0 : i32
    %c0_i32_1 = arith.constant 0 : i32
    return %c0_i32, %c0_i32_0 : i32, i32
  }
  func.func @transform_2(%arg0: i32, %arg1: memref<8xi32, #tpu.memory_space<smem>>) -> (i32, i32) {
    %c0_i32 = arith.constant 0 : i32
    %c0_i32_0 = arith.constant 0 : i32
    %c0_i32_1 = arith.constant 0 : i32
    return %c0_i32, %c0_i32_0 : i32, i32
  }
  func.func @transform_3(%arg0: i32, %arg1: memref<8xi32, #tpu.memory_space<smem>>) -> (i32, i32) {
    %c0_i32 = arith.constant 0 : i32
    %c0_i32_0 = arith.constant 0 : i32
    %c0_i32_1 = arith.constant 0 : i32
    return %c0_i32, %c0_i32_0 : i32, i32
  }
  func.func @transform_4(%arg0: i32, %arg1: memref<8xi32, #tpu.memory_space<smem>>) -> (i32, i32) {
    %c0_i32 = arith.constant 0 : i32
    %c0_i32_0 = arith.constant 0 : i32
    %c0_i32_1 = arith.constant 0 : i32
    return %c0_i32, %c0_i32_0 : i32, i32
  }
  func.func @transform_5(%arg0: i32, %arg1: memref<8xi32, #tpu.memory_space<smem>>) -> (i32, i32) {
    %c0_i32 = arith.constant 0 : i32
    %c0_i32_0 = arith.constant 0 : i32
    %c0_i32_1 = arith.constant 0 : i32
    return %c0_i32, %c0_i32_0 : i32, i32
  }
  func.func @transform_6(%arg0: i32, %arg1: memref<8xi32, #tpu.memory_space<smem>>) -> (i32, i32) {
    %c0_i32 = arith.constant 0 : i32
    %c0_i32_0 = arith.constant 0 : i32
    %c0_i32_1 = arith.constant 0 : i32
    return %c0_i32, %c0_i32_0 : i32, i32
  }
  func.func @transform_7(%arg0: i32, %arg1: memref<8xi32, #tpu.memory_space<smem>>) -> (i32, i32) {
    %c0_i32 = arith.constant 0 : i32
    %c0_i32_0 = arith.constant 0 : i32
    %c0_i32_1 = arith.constant 0 : i32
    return %c0_i32, %c0_i32_0 : i32, i32
  }
  func.func @transform_8(%arg0: i32, %arg1: memref<8xi32, #tpu.memory_space<smem>>) -> (i32, i32, i32) {
    %c0_i32 = arith.constant 0 : i32
    %c0_i32_0 = arith.constant 0 : i32
    %c0_i32_1 = arith.constant 0 : i32
    return %arg0, %c0_i32, %c0_i32_0 : i32, i32, i32
  }
}

</mosaic_0001>

<bundles_post_ra>
// kernel: _seq2seq_forward.2
= control target key start
LH: loop header
LB: loop body
LE: loop exit
PB: predicated region body
PF: predicated region fallthrough
CT: control target
= control target key end

     0   :  { %10 = vsyncpa [#allocation4], 0  ;;  %s739_s15 = smov 0   ;;  %s794_s0 = inlined_call_operand.vmem [shape: f32[8,8,128], index: 0, kind: input, shape index: {}]   ;;  %s795_s1 = inlined_call_operand.hbm [shape: f32[256,512], index: 1, kind: input, shape index: {}]   ;;  %s796_s2 = inlined_call_operand.vmem [shape: f32[1,512], index: 2, kind: input, shape index: {}]   ;;  %s797_s3 = inlined_call_operand.vmem [shape: f32[8,128], index: 3, kind: output, shape index: {0}]   ;;  %s798_s4 = inlined_call_operand.vmem [shape: f32[8,128], index: 4, kind: output, shape index: {1}]  }
   0x1 LB: > { %s142_s18 = sshll.u32 %s795_s1, 4  ;;  %s617_s19 = sadd.s32 4294967295, %s708_s15   ;;  %s708_s15 = sphi %s739_s15, %s16_s15   ;;  %s143_s18 = int_to_ptr.hbm [resolvable:$true] %s142_s18 }
   0x2   : > { %p618_p0 = scmp.ge.s32.totalorder %s708_s15, 1  ;;  %p131_p1 = scmp.lt.s32.totalorder %s708_s15, 9 }
   0x3   : > { %p619_p2 = scmp.ne.s32.totalorder %s617_s19, 0  ;;  %p638_p3 = scmp.eq.s32.totalorder %s617_s19, 0 }
   0x4   : > { %p132_p4 = pnand %p618_p0, %p131_p1  ;;  %s710_s20 = smov [#allocation3]  }
   0x5   : > { %s144_s21 = sshll.u32 %s710_s20, 4  ;;  %s711_s22 = smov 512   ;;  %s145_s21 = int_to_ptr.vmem [resolvable:$true] %s144_s21 }
   0x6   : > { %p634_p5 = pneg %p132_p4  ;;  %s712_s23 = smov 32  }
   0x7   : > { %170 = sbr.rel (%p132_p4) target bundleno = 256 (0x100), region = 32 }
   0x8   : > { %p635_p6 = pnand %p638_p3, %p634_p5 }
   0xa   : > { %637 = dma.hbm_to_vmem [thread:$0]  (!%p635_p6), %s143_s18, 16384, %s145_s21, [#allocation4], %s711_s22, %s711_s22, %s712_s23  }
   0xc   : > { %703 = dma.done.wait (%p638_p3), [#allocation4], 16384  }
   0xd   : > { %705 = vsyncadd (%p638_p3), [#allocation4], 4294950912  ;;  %p191_p7 = scmp.lt.s32.totalorder %s617_s19, 7 }
   0xe   : > { %198 = sbr.rel (%p619_p2) target bundleno = 22 (0x16), region = 40 }
   0xf   : > { %s192_s24 = scalar_select %p191_p7, %s617_s19, 7 }
  0x11   : > { %s623_s25 = sshll.u32 %s192_s24, 3 }
  0x12   : > { %s753_s28 = scalar_lea.vmem %s794_s0, %s623_s25 }
  0x13   : > { %v713_v0 = vmov 0.0  }
  0x14   : > { %200 = vst [vmem:[#allocation2 + $0x8] sm:$0xff] %v713_v0 }
  0x15   : > { %201 = vst [vmem:[%s798_s4] sm:$0xff] %v713_v0 }
  0x16 PF: > { %v267_v1 = vld [vmem:[#allocation3 + $0x1e8] sm:$0xff]  ;;  %v266_v4 = vld [vmem:[#allocation3 + $0x1e0] sm:$0xff]  ;;  %v760_v54 = vld [vmem:[%s753_s28] sm:$0xff] }
  0x17   : > { %v263_v2 = vld [vmem:[#allocation3 + $0x1c8] sm:$0xff]  ;;  %384 = vmatpush.msra.mxu2 %v267_v1  ;;  %344 = vmatpush.msra.mxu0 %v266_v4  ;;  %v262_v7 = vld [vmem:[#allocation3 + $0x1c0] sm:$0xff]  ;;  %v269_v63 = vld [vmem:[#allocation3 + $0x1f8] sm:$0xff] }
  0x18   : > { %v331_v3 = vld [vmem:[#allocation3 + $0x3e8] sm:$0xff]  ;;  %v330_v8 = vld [vmem:[#allocation3 + $0x3e0] sm:$0xff]  ;;  %v268_v4 = vld [vmem:[#allocation3 + $0x1f0] sm:$0xff] }
  0x19   : > { %404 = vmatpush.msra.mxu3 %v331_v3  ;;  %v327_v5 = vld [vmem:[#allocation3 + $0x3c8] sm:$0xff]  ;;  %385 = vmatpush.msra.mxu2 %v263_v2  ;;  %v258_v10 = vld [vmem:[#allocation3 + $0x1a0] sm:$0xff]  ;;  %v333_v2 = vld [vmem:[#allocation3 + $0x3f8] sm:$0xff] }
  0x1a   : > { %v259_v6 = vld [vmem:[#allocation3 + $0x1a8] sm:$0xff]  ;;  %v326_v11 = vld [vmem:[#allocation3 + $0x3c0] sm:$0xff]  ;;  %345 = vmatpush.msra.mxu0 %v262_v7  ;;  %364 = vmatpush.msra.mxu1 %v330_v8  ;;  %v265_v3 = vld [vmem:[#allocation3 + $0x1d8] sm:$0xff] }
  0x1b   : > { %405 = vmatpush.msra.mxu3 %v327_v5  ;;  %v323_v9 = vld [vmem:[#allocation3 + $0x3a8] sm:$0xff]  ;;  %386 = vmatpush.msra.mxu2 %v259_v6  ;;  %v254_v14 = vld [vmem:[#allocation3 + $0x180] sm:$0xff]  ;;  %v329_v6 = vld [vmem:[#allocation3 + $0x3d8] sm:$0xff] }
  0x1c   : > { %v255_v12 = vld [vmem:[#allocation3 + $0x188] sm:$0xff]  ;;  %v322_v15 = vld [vmem:[#allocation3 + $0x3a0] sm:$0xff]  ;;  %346 = vmatpush.msra.mxu0 %v258_v10  ;;  %365 = vmatpush.msra.mxu1 %v326_v11  ;;  %v261_v7 = vld [vmem:[#allocation3 + $0x1b8] sm:$0xff] }
  0x1d   : > { %v319_v13 = vld [vmem:[#allocation3 + $0x388] sm:$0xff]  ;;  %406 = vmatpush.msra.mxu3 %v323_v9  ;;  %387 = vmatpush.msra.mxu2 %v255_v12  ;;  %v250_v18 = vld [vmem:[#allocation3 + $0x160] sm:$0xff]  ;;  %v264_v8 = vld [vmem:[#allocation3 + $0x1d0] sm:$0xff] }
  0x1e   : > { %v251_v16 = vld [vmem:[#allocation3 + $0x168] sm:$0xff]  ;;  %v318_v19 = vld [vmem:[#allocation3 + $0x380] sm:$0xff]  ;;  %347 = vmatpush.msra.mxu0 %v254_v14  ;;  %366 = vmatpush.msra.mxu1 %v322_v15  ;;  %v332_v9 = vld [vmem:[#allocation3 + $0x3f0] sm:$0xff] }
  0x1f   : > { %v315_v17 = vld [vmem:[#allocation3 + $0x368] sm:$0xff]  ;;  %407 = vmatpush.msra.mxu3 %v319_v13  ;;  %388 = vmatpush.msra.mxu2 %v251_v16  ;;  %v246_v22 = vld [vmem:[#allocation3 + $0x140] sm:$0xff]  ;;  %v325_v10 = vld [vmem:[#allocation3 + $0x3b8] sm:$0xff] }
  0x20   : > { %v247_v20 = vld [vmem:[#allocation3 + $0x148] sm:$0xff]  ;;  %v314_v23 = vld [vmem:[#allocation3 + $0x360] sm:$0xff]  ;;  %348 = vmatpush.msra.mxu0 %v250_v18  ;;  %367 = vmatpush.msra.mxu1 %v318_v19  ;;  %v257_v11 = vld [vmem:[#allocation3 + $0x198] sm:$0xff] }
  0x21   : > { %v311_v21 = vld [vmem:[#allocation3 + $0x348] sm:$0xff]  ;;  %408 = vmatpush.msra.mxu3 %v315_v17  ;;  %389 = vmatpush.msra.mxu2 %v247_v20  ;;  %v242_v26 = vld [vmem:[#allocation3 + $0x120] sm:$0xff]  ;;  %v260_v12 = vld [vmem:[#allocation3 + $0x1b0] sm:$0xff] }
  0x22   : > { %v243_v24 = vld [vmem:[#allocation3 + $0x128] sm:$0xff]  ;;  %v310_v27 = vld [vmem:[#allocation3 + $0x340] sm:$0xff]  ;;  %349 = vmatpush.msra.mxu0 %v246_v22  ;;  %368 = vmatpush.msra.mxu1 %v314_v23  ;;  %v328_v13 = vld [vmem:[#allocation3 + $0x3d0] sm:$0xff] }
  0x23   : > { %v307_v25 = vld [vmem:[#allocation3 + $0x328] sm:$0xff]  ;;  %409 = vmatpush.msra.mxu3 %v311_v21  ;;  %390 = vmatpush.msra.mxu2 %v243_v24  ;;  %v238_v30 = vld [vmem:[#allocation3 + $0x100] sm:$0xff]  ;;  %v253_v14 = vld [vmem:[#allocation3 + $0x178] sm:$0xff] }
  0x24   : > { %v239_v28 = vld [vmem:[#allocation3 + $0x108] sm:$0xff]  ;;  %v306_v31 = vld [vmem:[#allocation3 + $0x320] sm:$0xff]  ;;  %350 = vmatpush.msra.mxu0 %v242_v26  ;;  %369 = vmatpush.msra.mxu1 %v310_v27  ;;  %v321_v15 = vld [vmem:[#allocation3 + $0x398] sm:$0xff] }
  0x25   : > { %v303_v29 = vld [vmem:[#allocation3 + $0x308] sm:$0xff]  ;;  %410 = vmatpush.msra.mxu3 %v307_v25  ;;  %391 = vmatpush.msra.mxu2 %v239_v28  ;;  %v234_v34 = vld [vmem:[#allocation3 + $0xe0] sm:$0xff]  ;;  %v762_v16 = vld [vmem:[#allocation2 + $0x8] sm:$0xff] }
  0x26   : > { %v235_v32 = vld [vmem:[#allocation3 + $0xe8] sm:$0xff]  ;;  %v302_v35 = vld [vmem:[#allocation3 + $0x300] sm:$0xff]  ;;  %351 = vmatpush.msra.mxu0 %v238_v30  ;;  %370 = vmatpush.msra.mxu1 %v306_v31  ;;  %v256_v17 = vld [vmem:[#allocation3 + $0x190] sm:$0xff] }
  0x27   : > { %v299_v33 = vld [vmem:[#allocation3 + $0x2e8] sm:$0xff]  ;;  %411 = vmatpush.msra.mxu3 %v303_v29  ;;  %392 = vmatpush.msra.mxu2 %v235_v32  ;;  %v230_v38 = vld [vmem:[#allocation3 + $0xc0] sm:$0xff]  ;;  %v324_v18 = vld [vmem:[#allocation3 + $0x3b0] sm:$0xff] }
  0x28   : > { %v231_v36 = vld [vmem:[#allocation3 + $0xc8] sm:$0xff]  ;;  %v298_v39 = vld [vmem:[#allocation3 + $0x2e0] sm:$0xff]  ;;  %352 = vmatpush.msra.mxu0 %v234_v34  ;;  %371 = vmatpush.msra.mxu1 %v302_v35  ;;  %v249_v19 = vld [vmem:[#allocation3 + $0x158] sm:$0xff] }
  0x29   : > { %v295_v37 = vld [vmem:[#allocation3 + $0x2c8] sm:$0xff]  ;;  %412 = vmatpush.msra.mxu3 %v299_v33  ;;  %393 = vmatpush.msra.mxu2 %v231_v36  ;;  %v226_v42 = vld [vmem:[#allocation3 + $0xa0] sm:$0xff]  ;;  %v317_v20 = vld [vmem:[#allocation3 + $0x378] sm:$0xff] }
  0x2a   : > { %v227_v40 = vld [vmem:[#allocation3 + $0xa8] sm:$0xff]  ;;  %v294_v43 = vld [vmem:[#allocation3 + $0x2c0] sm:$0xff]  ;;  %353 = vmatpush.msra.mxu0 %v230_v38  ;;  %372 = vmatpush.msra.mxu1 %v298_v39  ;;  %v252_v21 = vld [vmem:[#allocation3 + $0x170] sm:$0xff] }
  0x2b   : > { %v291_v41 = vld [vmem:[#allocation3 + $0x2a8] sm:$0xff]  ;;  %413 = vmatpush.msra.mxu3 %v295_v37  ;;  %394 = vmatpush.msra.mxu2 %v227_v40  ;;  %v222_v46 = vld [vmem:[#allocation3 + $0x80] sm:$0xff]  ;;  %v320_v22 = vld [vmem:[#allocation3 + $0x390] sm:$0xff] }
  0x2c   : > { %v223_v44 = vld [vmem:[#allocation3 + $0x88] sm:$0xff]  ;;  %v290_v47 = vld [vmem:[#allocation3 + $0x2a0] sm:$0xff]  ;;  %354 = vmatpush.msra.mxu0 %v226_v42  ;;  %373 = vmatpush.msra.mxu1 %v294_v43  ;;  %v245_v23 = vld [vmem:[#allocation3 + $0x138] sm:$0xff] }
  0x2d   : > { %v287_v45 = vld [vmem:[#allocation3 + $0x288] sm:$0xff]  ;;  %414 = vmatpush.msra.mxu3 %v291_v41  ;;  %395 = vmatpush.msra.mxu2 %v223_v44  ;;  %v218_v50 = vld [vmem:[#allocation3 + $0x60] sm:$0xff]  ;;  %v313_v24 = vld [vmem:[#allocation3 + $0x358] sm:$0xff] }
  0x2e   : > { %v219_v48 = vld [vmem:[#allocation3 + $0x68] sm:$0xff]  ;;  %v286_v51 = vld [vmem:[#allocation3 + $0x280] sm:$0xff]  ;;  %355 = vmatpush.msra.mxu0 %v222_v46  ;;  %374 = vmatpush.msra.mxu1 %v290_v47  ;;  %v248_v25 = vld [vmem:[#allocation3 + $0x150] sm:$0xff] }
  0x2f   : > { %v283_v49 = vld [vmem:[#allocation3 + $0x268] sm:$0xff]  ;;  %415 = vmatpush.msra.mxu3 %v287_v45  ;;  %396 = vmatpush.msra.mxu2 %v219_v48  ;;  %v214_v55 = vld [vmem:[#allocation3 + $0x40] sm:$0xff]  ;;  %v316_v26 = vld [vmem:[#allocation3 + $0x370] sm:$0xff] }
  0x30   : > { %v215_v52 = vld [vmem:[#allocation3 + $0x48] sm:$0xff]  ;;  %v282_v56 = vld [vmem:[#allocation3 + $0x260] sm:$0xff]  ;;  %356 = vmatpush.msra.mxu0 %v218_v50  ;;  %375 = vmatpush.msra.mxu1 %v286_v51  ;;  %v241_v27 = vld [vmem:[#allocation3 + $0x118] sm:$0xff] }
  0x31   : > { %v279_v53 = vld [vmem:[#allocation3 + $0x248] sm:$0xff]  ;;  %416 = vmatpush.msra.mxu3 %v283_v49  ;;  %397 = vmatpush.msra.mxu2 %v215_v52  ;;  %v210_v59 = vld [vmem:[#allocation3 + $0x20] sm:$0xff]  ;;  %v309_v28 = vld [vmem:[#allocation3 + $0x338] sm:$0xff] }
  0x32   : > { %v211_v57 = vld [vmem:[#allocation3 + $0x28] sm:$0xff]  ;;  %v278_v60 = vld [vmem:[#allocation3 + $0x240] sm:$0xff]  ;;  %357 = vmatpush.msra.mxu0 %v214_v55  ;;  %376 = vmatpush.msra.mxu1 %v282_v56  ;;  %v244_v29 = vld [vmem:[#allocation3 + $0x130] sm:$0xff] }
  0x33   : > { %v275_v58 = vld [vmem:[#allocation3 + $0x228] sm:$0xff]  ;;  %417 = vmatpush.msra.mxu3 %v279_v53  ;;  %398 = vmatpush.msra.mxu2 %v211_v57  ;;  %v206_v0 = vld [vmem:[#allocation3] sm:$0xff]  ;;  %v312_v30 = vld [vmem:[#allocation3 + $0x350] sm:$0xff] }
  0x34   : > { %v207_v61 = vld [vmem:[#allocation3 + $0x8] sm:$0xff]  ;;  %358 = vmatpush.msra.mxu0 %v210_v59  ;;  %377 = vmatpush.msra.mxu1 %v278_v60  ;;  %v274_v1 = vld [vmem:[#allocation3 + $0x220] sm:$0xff]  ;;  %v237_v31 = vld [vmem:[#allocation3 + $0xf8] sm:$0xff] }
  0x35   : > { %v271_v62 = vld [vmem:[#allocation3 + $0x208] sm:$0xff]  ;;  %418 = vmatpush.msra.mxu3 %v275_v58  ;;  %399 = vmatpush.msra.mxu2 %v207_v61  ;;  %v270_v5 = vld [vmem:[#allocation3 + $0x200] sm:$0xff]  ;;  %v305_v32 = vld [vmem:[#allocation3 + $0x318] sm:$0xff] }
  0x36   : > { %359 = vmatpush.msra.mxu0 %v206_v0  ;;  %378 = vmatpush.msra.mxu1 %v274_v1  ;;  %v240_v33 = vld [vmem:[#allocation3 + $0x110] sm:$0xff]  ;;  %v233_v35 = vld [vmem:[#allocation3 + $0xd8] sm:$0xff] }
  0x37   : > { %419 = vmatpush.msra.mxu3 %v271_v62  ;;  %464 = vmatpush.msrb.mxu2 %v269_v63  ;;  %v308_v34 = vld [vmem:[#allocation3 + $0x330] sm:$0xff]  ;;  %v301_v36 = vld [vmem:[#allocation3 + $0x2f8] sm:$0xff] }
  0x38   : > { %424 = vmatpush.msrb.mxu0 %v268_v4  ;;  %379 = vmatpush.msra.mxu1 %v270_v5  ;;  %v236_v37 = vld [vmem:[#allocation3 + $0xf0] sm:$0xff]  ;;  %v229_v39 = vld [vmem:[#allocation3 + $0xb8] sm:$0xff] }
  0x39   : > { %484 = vmatpush.msrb.mxu3 %v333_v2  ;;  %465 = vmatpush.msrb.mxu2 %v265_v3  ;;  %v304_v38 = vld [vmem:[#allocation3 + $0x310] sm:$0xff]  ;;  %v297_v40 = vld [vmem:[#allocation3 + $0x2d8] sm:$0xff] }
  0x3a   : > { %425 = vmatpush.msrb.mxu0 %v264_v8  ;;  %444 = vmatpush.msrb.mxu1 %v332_v9  ;;  %v232_v41 = vld [vmem:[#allocation3 + $0xd0] sm:$0xff]  ;;  %v225_v43 = vld [vmem:[#allocation3 + $0x98] sm:$0xff] }
  0x3b   : > { %485 = vmatpush.msrb.mxu3 %v329_v6  ;;  %466 = vmatpush.msrb.mxu2 %v261_v7  ;;  %v300_v42 = vld [vmem:[#allocation3 + $0x2f0] sm:$0xff]  ;;  %v293_v44 = vld [vmem:[#allocation3 + $0x2b8] sm:$0xff] }
  0x3c   : > { %426 = vmatpush.msrb.mxu0 %v260_v12  ;;  %400 = vmatmul.f32.vlgmr.msra.gmra.mxu2 %v760_v54  ;;  %v228_v45 = vld [vmem:[#allocation3 + $0xb0] sm:$0xff]  ;;  %v221_v47 = vld [vmem:[#allocation3 + $0x78] sm:$0xff] }
  0x3d   : > { %486 = vmatpush.msrb.mxu3 %v325_v10  ;;  %467 = vmatpush.msrb.mxu2 %v257_v11  ;;  %v296_v46 = vld [vmem:[#allocation3 + $0x2d0] sm:$0xff]  ;;  %v289_v48 = vld [vmem:[#allocation3 + $0x298] sm:$0xff] }
  0x3e   : > { %445 = vmatpush.msrb.mxu1 %v328_v13  ;;  %420 = vmatmul.f32.vlgmr.msra.gmra.mxu3 %v762_v16  ;;  %v224_v49 = vld [vmem:[#allocation3 + $0x90] sm:$0xff]  ;;  %v217_v51 = vld [vmem:[#allocation3 + $0x58] sm:$0xff] }
  0x3f   : > { %468 = vmatpush.msrb.mxu2 %v253_v14  ;;  %487 = vmatpush.msrb.mxu3 %v321_v15  ;;  %v292_v50 = vld [vmem:[#allocation3 + $0x2b0] sm:$0xff]  ;;  %v285_v52 = vld [vmem:[#allocation3 + $0x278] sm:$0xff] }
  0x40   : > { %427 = vmatpush.msrb.mxu0 %v256_v17  ;;  %446 = vmatpush.msrb.mxu1 %v324_v18  ;;  %v220_v53 = vld [vmem:[#allocation3 + $0x70] sm:$0xff]  ;;  %v213_v56 = vld [vmem:[#allocation3 + $0x38] sm:$0xff] }
  0x41   : > { %469 = vmatpush.msrb.mxu2 %v249_v19  ;;  %488 = vmatpush.msrb.mxu3 %v317_v20  ;;  %v288_v55 = vld [vmem:[#allocation3 + $0x290] sm:$0xff]  ;;  %v281_v57 = vld [vmem:[#allocation3 + $0x258] sm:$0xff] }
  0x42   : > { %428 = vmatpush.msrb.mxu0 %v252_v21  ;;  %447 = vmatpush.msrb.mxu1 %v320_v22  ;;  %v216_v58 = vld [vmem:[#allocation3 + $0x50] sm:$0xff]  ;;  %v209_v60 = vld [vmem:[#allocation3 + $0x18] sm:$0xff] }
  0x43   : > { %470 = vmatpush.msrb.mxu2 %v245_v23  ;;  %489 = vmatpush.msrb.mxu3 %v313_v24  ;;  %v284_v59 = vld [vmem:[#allocation3 + $0x270] sm:$0xff]  ;;  %v277_v61 = vld [vmem:[#allocation3 + $0x238] sm:$0xff] }
  0x44   : > { %360 = vmatmul.f32.vlgmr.msra.gmra.mxu0 %v760_v54  ;;  %448 = vmatpush.msrb.mxu1 %v316_v26  ;;  %v212_v62 = vld [vmem:[#allocation3 + $0x30] sm:$0xff]  ;;  %v273_v0 = vld [vmem:[#allocation3 + $0x218] sm:$0xff] }
  0x45   : > { %429 = vmatpush.msrb.mxu0 %v248_v25  ;;  %471 = vmatpush.msrb.mxu2 %v241_v27  ;;  %v280_v63 = vld [vmem:[#allocation3 + $0x250] sm:$0xff] }
  0x46   : > { %490 = vmatpush.msrb.mxu3 %v309_v28  ;;  %380 = vmatmul.f32.vlgmr.msra.gmra.mxu1 %v762_v16  ;;  %v208_v1 = vld [vmem:[#allocation3 + $0x10] sm:$0xff] }
  0x47   : > { %430 = vmatpush.msrb.mxu0 %v244_v29  ;;  %449 = vmatpush.msrb.mxu1 %v312_v30  ;;  %v276_v2 = vld [vmem:[#allocation3 + $0x230] sm:$0xff] }
  0x48   : > { %472 = vmatpush.msrb.mxu2 %v237_v31  ;;  %491 = vmatpush.msrb.mxu3 %v305_v32  ;;  %v272_v3 = vld [vmem:[#allocation3 + $0x210] sm:$0xff] }
  0x49   : > { %431 = vmatpush.msrb.mxu0 %v240_v33  ;;  %450 = vmatpush.msrb.mxu1 %v308_v34  ;;  %v334_v4 = vld [vmem:[%s796_s2] sm:$0xf] }
  0x4a   : > { %473 = vmatpush.msrb.mxu2 %v233_v35  ;;  %492 = vmatpush.msrb.mxu3 %v301_v36  ;;  %v336_v5 = vperm.slane %v334_v4, 0  ;;  %v337_v6 = vperm.slane %v334_v4, 1  ;;  %v338_v20 = vperm.slane %v334_v4, 2  ;;  %v339_v25 = vperm.slane %v334_v4, 3 }
  0x4b   : > { %432 = vmatpush.msrb.mxu0 %v236_v37  ;;  %451 = vmatpush.msrb.mxu1 %v304_v38 }
  0x4c   : > { %474 = vmatpush.msrb.mxu2 %v229_v39  ;;  %493 = vmatpush.msrb.mxu3 %v297_v40 }
  0x4d   : > { %433 = vmatpush.msrb.mxu0 %v232_v41  ;;  %452 = vmatpush.msrb.mxu1 %v300_v42 }
  0x4e   : > { %475 = vmatpush.msrb.mxu2 %v225_v43  ;;  %494 = vmatpush.msrb.mxu3 %v293_v44 }
  0x4f   : > { %434 = vmatpush.msrb.mxu0 %v228_v45  ;;  %453 = vmatpush.msrb.mxu1 %v296_v46 }
  0x50   : > { %476 = vmatpush.msrb.mxu2 %v221_v47  ;;  %495 = vmatpush.msrb.mxu3 %v289_v48  ;;  %v562_v47 = vld [vmem:[%s798_s4] sm:$0xff] }
  0x51   : > { %435 = vmatpush.msrb.mxu0 %v224_v49  ;;  %454 = vmatpush.msrb.mxu1 %v292_v50 }
  0x52   : > { %477 = vmatpush.msrb.mxu2 %v217_v51  ;;  %496 = vmatpush.msrb.mxu3 %v285_v52 }
  0x53   : > { %436 = vmatpush.msrb.mxu0 %v220_v53  ;;  %455 = vmatpush.msrb.mxu1 %v288_v55 }
  0x54   : > { %478 = vmatpush.msrb.mxu2 %v213_v56  ;;  %497 = vmatpush.msrb.mxu3 %v281_v57 }
  0x55   : > { %437 = vmatpush.msrb.mxu0 %v216_v58  ;;  %456 = vmatpush.msrb.mxu1 %v284_v59 }
  0x56   : > { %479 = vmatpush.msrb.mxu2 %v209_v60  ;;  %498 = vmatpush.msrb.mxu3 %v277_v61 }
  0x57   : > { %438 = vmatpush.msrb.mxu0 %v212_v62  ;;  %457 = vmatpush.msrb.mxu1 %v280_v63 }
  0x58   : > { %480 = vmatmul.f32.vlgmr.msrb.gmra.mxu2 %v760_v54  ;;  %499 = vmatpush.msrb.mxu3 %v273_v0 }
  0x59   : > { %439 = vmatpush.msrb.mxu0 %v208_v1  ;;  %458 = vmatpush.msrb.mxu1 %v276_v2 }
  0x5a   : > { %500 = vmatmul.f32.vlgmr.msrb.gmra.mxu3 %v762_v16  ;;  %440 = vmatmul.f32.vlgmr.msrb.gmra.mxu0 %v760_v54 }
  0x5b   : > { %459 = vmatpush.msrb.mxu1 %v272_v3 }
  0x5c   : > { %460 = vmatmul.f32.vlgmr.msrb.gmra.mxu1 %v762_v16 }
  0xbf   : > { %v401_v8 = vpop.f32.mrf.mxu2 }
  0xc0   : > { %v402_v10 = vadd.f32 %v401_v8, %v337_v6 }
  0xc1   : > { %v361_v7 = vpop.f32.mrf.mxu0  ;;  %v421_v11 = vpop.f32.mrf.mxu3 }
  0xc2   : > { %v362_v9 = vadd.f32 %v361_v7, %v336_v5  ;;  %v422_v13 = vadd.f32 %v421_v11, %v402_v10 }
  0xc3   : > { %v381_v12 = vpop.f32.mrf.mxu1 }
  0xc4   : > { %v382_v14 = vadd.f32 %v381_v12, %v362_v9  ;;  %v626_v15 = vmul.f32 -1.442695, %v422_v13 }
  0xc6   : > { %v625_v17 = vmul.f32 -1.442695, %v382_v14  ;;  %652 = vpow2.f32 %v626_v15 }
  0xc8   : > { %654 = vpow2.f32 %v625_v17 }
  0xcc   : > { %v653_v54 = vpop.eup %652 }
  0xcd   : > { %v526_v18 = vadd.f32 1.0, %v653_v54 }
  0xce   : > { %v655_v16 = vpop.eup %654 }
  0xcf   : > { %v507_v19 = vadd.f32 1.0, %v655_v16  ;;  %656 = vrcp.f32 %v526_v18  ;;  %vm532_vm0 = vweird.f32 %v526_v18  ;;  %v538_v27 = vand.u32 2147483648, %v526_v18 }
  0xd0   : > { %v536_v29 = vand.u32 2147483647, %v526_v18 }
  0xd1   : > { %658 = vrcp.f32 %v507_v19  ;;  %vm513_vm2 = vweird.f32 %v507_v19  ;;  %v519_v32 = vand.u32 2147483648, %v507_v19  ;;  %v517_v35 = vand.u32 2147483647, %v507_v19 }
  0xd2   : > { %v539_v40 = vor.u32 1.1754944e-38, %v538_v27  ;;  %vm537_vm6 = vcmp.eq.f32.partialorder %v536_v29, 8.507059e+37 }
  0xd3   : > { %v520_v43 = vor.u32 1.1754944e-38, %v519_v32  ;;  %vm518_vm7 = vcmp.eq.f32.partialorder %v517_v35, 8.507059e+37 }
  0xd5   : > { %v657_v21 = vpop.eup %656 }
  0xd6   : > { %v528_v23 = vmul.f32 %v657_v21, %v526_v18  ;;  %vm533_vm1 = vweird.f32 %v657_v21 }
  0xd7   : > { %v659_v22 = vpop.eup %658  ;;  %v441_v24 = vpop.f32.mrf.mxu0  ;;  %vm776_vm4 = vmor %vm532_vm0, %vm533_vm1 }
  0xd8   : > { %v509_v26 = vmul.f32 %v659_v22, %v507_v19  ;;  %v442_v28 = vadd.f32 %v441_v24, %v338_v20  ;;  %v529_v30 = vsub.f32 1.0, %v528_v23  ;;  %vm514_vm3 = vweird.f32 %v659_v22 }
  0xd9   : > { %v461_v31 = vpop.f32.mrf.mxu1  ;;  %vm515_vm5 = vmor %vm513_vm2, %vm514_vm3 }
  0xda   : > { %v510_v33 = vsub.f32 1.0, %v509_v26  ;;  %v462_v34 = vadd.f32 %v461_v31, %v442_v28  ;;  %v530_v37 = vmul.f32 %v657_v21, %v529_v30 }
  0xdb   : > { %v481_v36 = vpop.f32.mrf.mxu2 }
  0xdc   : > { %v482_v38 = vadd.f32 %v481_v36, %v339_v25  ;;  %v511_v41 = vmul.f32 %v659_v22, %v510_v33  ;;  %660 = vtanh.f32 %v462_v34  ;;  %v531_v44 = vadd.f32 %v657_v21, %v530_v37 }
  0xdd   : > { %v501_v42 = vpop.f32.mrf.mxu3 }
  0xde   : > { %v502_v45 = vadd.f32 %v501_v42, %v482_v38  ;;  %v512_v46 = vadd.f32 %v659_v22, %v511_v41  ;;  %v535_v48 = vsel %vm776_vm4, %v657_v21, %v531_v44 }
  0xdf   : > { %v540_v51 = vsel %vm537_vm6, %v539_v40, %v535_v48 }
  0xe0   : > { %v627_v49 = vmul.f32 -1.442695, %v502_v45  ;;  %v516_v50 = vsel %vm515_vm5, %v659_v22, %v512_v46  ;;  %v563_v53 = vmul.f32 %v562_v47, %v540_v51 }
  0xe1   : > { %v521_v52 = vsel %vm518_vm7, %v520_v43, %v516_v50 }
  0xe2   : > { %662 = vpow2.f32 %v627_v49  ;;  %v661_v55 = vpop.eup %660 }
  0xe3   : > { %v564_v56 = vmul.f32 %v661_v55, %v521_v52 }
  0xe5   : > { %v565_v57 = vadd.f32 %v564_v56, %v563_v53 }
  0xe7   : > { %568 = vst [vmem:[%s798_s4] sm:$0xff] %v565_v57 }
  0xe8   : > { %v663_v58 = vpop.eup %662 }
  0xe9   : > { %v546_v59 = vadd.f32 1.0, %v663_v58 }
  0xeb   : > { %664 = vrcp.f32 %v546_v59  ;;  %v558_v63 = vand.u32 2147483648, %v546_v59  ;;  %v556_v1 = vand.u32 2147483647, %v546_v59  ;;  %vm552_vm9 = vweird.f32 %v546_v59 }
  0xec   : > { %666 = vtanh.f32 %v565_v57 }
  0xed   : > { %v559_v3 = vor.u32 1.1754944e-38, %v558_v63  ;;  %vm557_vm11 = vcmp.eq.f32.partialorder %v556_v1, 8.507059e+37 }
  0xf1   : > { %v665_v60 = vpop.eup %664 }
  0xf2   : > { %v548_v61 = vmul.f32 %v665_v60, %v546_v59  ;;  %vm553_vm8 = vweird.f32 %v665_v60  ;;  %v667_v5 = vpop.eup %666 }
  0xf3   : > { %vm554_vm10 = vmor %vm552_vm9, %vm553_vm8 }
  0xf4   : > { %v549_v62 = vsub.f32 1.0, %v548_v61 }
  0xf6   : > { %v550_v0 = vmul.f32 %v665_v60, %v549_v62 }
  0xf8   : > { %v551_v2 = vadd.f32 %v665_v60, %v550_v0 }
  0xfa   : > { %v555_v4 = vsel %vm554_vm10, %v665_v60, %v551_v2 }
  0xfb   : > { %v560_v6 = vsel %vm557_vm11, %v559_v3, %v555_v4 }
  0xfc   : > { %v567_v7 = vmul.f32 %v667_v5, %v560_v6 }
  0xfe   : > { %569 = vst [vmem:[%s797_s3] sm:$0xff] %v567_v7 }
  0xff   : > { %570 = vst [vmem:[#allocation2 + $0x8] sm:$0xff] %v567_v7 }
 0x100 PF: > { %s16_s15 = sadd.s32 1, %s708_s15  }
 0x101   : > { %p13_p8 = scmp.ge.s32.totalorder %s16_s15, 10  }
 0x103   :  { %15 = sbr.rel (!%p13_p8) target bundleno = 1 (0x1), region = 75 }
 0x108   :  { %588 = vsyncpa [#allocation4], 1 }
 0x109   :  { %590 = vsyncpa [#allocation4 + $0x1], 1 }

// kernel: _seq2seq_forward.3
= control target key start
LH: loop header
LB: loop body
LE: loop exit
PB: predicated region body
PF: predicated region fallthrough
CT: control target
= control target key end

     0   :  { %s1117_s12 = smov [#allocation5]   ;;  %s1428_s0 = inlined_call_operand.vmem [shape: s32[8], index: 0, kind: input, shape index: {}]   ;;  %s1429_s1 = inlined_call_operand.vmem [shape: f32[8,8,128], index: 1, kind: input, shape index: {}]   ;;  %s1430_s2 = inlined_call_operand.vmem [shape: f32[8,128], index: 2, kind: input, shape index: {}]   ;;  %s1431_s3 = inlined_call_operand.vmem [shape: f32[8,128], index: 3, kind: input, shape index: {}]   ;;  %s1432_s4 = inlined_call_operand.hbm [shape: f32[256,512], index: 4, kind: input, shape index: {}]   ;;  %s1433_s5 = inlined_call_operand.vmem [shape: f32[1,512], index: 5, kind: input, shape index: {}]   ;;  %s1434_s6 = inlined_call_operand.vmem [shape: f32[128,128], index: 6, kind: input, shape index: {}]   ;;  %s1435_s7 = inlined_call_operand.vmem [shape: f32[1,128], index: 7, kind: input, shape index: {}]   ;;  %s1436_s8 = inlined_call_operand.vmem [shape: f32[128,128], index: 8, kind: input, shape index: {}]   ;;  %s1437_s9 = inlined_call_operand.hbm [shape: f32[8,8,128], index: 9, kind: output, shape index: {}]  }
   0x1   :  { %1438 = sst [smem:[#allocation13_spill]] %s1429_s1  ;;  %s15_s11 = sshll.u32 %s1428_s0, 4  ;;  %s16_s11 = int_to_ptr.vmem [resolvable:$true] %s15_s11 }
   0x2   :  { %18 = dma.vmem_to_smem %s16_s11, 16, %s1117_s12, [#allocation4] }
   0x3   :  { %1091 = dma.done.wait [#allocation4], 16 }
   0x4   :  { %1092 = vsyncadd [#allocation4], 4294967280 }
   0x5   :  { %21 = sfence }
   0x6   :  { %22 = vsyncpa [#allocation7], 0 }
   0x7   :  { %23 = vsyncpa [#allocation8], 0 }
   0x8   :  { %25 = vsyncpa [#allocation8 + $0x1], 0  ;;  %s1176_s13 = smov 0   ;;  %s1178_s14 = smov 0  }
   0x9   :  { %s1180_s15 = smov 0   ;;  %s1182_s16 = smov 0  }
   0xa LB: > { %s1197_s0 = sadd.s32 4294967295, %s1115_s16   ;;  %s914_s17 = sadd.s32 4294967294, %s1115_s16   ;;  %s1115_s16 = sphi %s1182_s16, %s1447_s16   ;;  %s1111_s15 = sphi %s1180_s15, %s1446_s15   ;;  %s1107_s14 = sphi %s1178_s14, %s1445_s14   ;;  %s1103_s13 = sphi %s1176_s13, %s1444_s13  }
   0xb   : > { %s1201_s18 = sadd.s32 1, %s1115_s16   ;;  %s211_s19 = sadd.s32 1, %s1111_s15 }
   0xc   : > { %s208_s20 = ssub.s32 %s1115_s16, %s1201_s18  ;;  %p221_p0 = scmp.ne.s32.totalorder %s1111_s15, %s1107_s14 }
   0xd   : > { %p209_p1 = scmp.eq.s32.totalorder %s208_s20, 0  ;;  %p222_p2 = scmp.eq.s32.totalorder %s1197_s0, 7 }
   0xe   : > { %p227_p3 = scmp.ne.s32.totalorder %s1107_s14, %s1103_s13  ;;  %p228_p4 = scmp.eq.s32.totalorder %s914_s17, 7 }
   0xf   : > { %s1212_s21 = scalar_select %p209_p1, %s1111_s15, %s211_s19  }
  0x10   : > { %p1214_p5 = por %p222_p2, %p221_p0  ;;  %p1218_p6 = por %p228_p4, %p227_p3 }
  0x11   : > { %p915_p7 = scmp.ge.s32.totalorder %s1115_s16, 1  ;;  %p235_p8 = scmp.lt.s32.totalorder %s1115_s16, 9 }
  0x12   : > { %p916_p9 = scmp.ne.s32.totalorder %s1197_s0, 0  ;;  %p947_p10 = scmp.eq.s32.totalorder %s1197_s0, 0 }
  0x13   : > { %p236_p11 = pnand %p915_p7, %p235_p8  ;;  %s252_s26 = sshll.u32 %s1432_s4, 4  ;;  %s253_s26 = int_to_ptr.hbm [resolvable:$true] %s252_s26 }
  0x14   : > { %s1118_s27 = smov [#allocation6]   ;;  %s1119_s29 = smov 512  }
  0x15   : > { %p939_p12 = pneg %p236_p11  ;;  %s254_s28 = sshll.u32 %s1118_s27, 4  ;;  %s255_s28 = int_to_ptr.vmem [resolvable:$true] %s254_s28 }
  0x16   : > { %s1120_s30 = smov 32   ;;  %289 = sbr.rel (%p236_p11) target bundleno = 935 (0x3a7), region = 52 }
  0x17   : > { %p940_p13 = pnand %p947_p10, %p939_p12 }
  0x19   : > { %942 = dma.hbm_to_vmem [thread:$0]  (!%p940_p13), %s253_s26, 16384, %s255_s28, [#allocation7], %s1119_s29, %s1119_s29, %s1120_s30  }
  0x1b   : > { %1094 = dma.done.wait (%p947_p10), [#allocation7], 16384  }
  0x1c   : > { %1096 = vsyncadd (%p947_p10), [#allocation7], 4294950912  ;;  %s320_s10 = sand.u32 1, %s1107_s14   ;;  %p323_p0 = scmp.lt.s32.totalorder %s1197_s0, 7 }
  0x1d   : > { %s920_s11 = sshll.u32 %s320_s10, 3  ;;  %s1441_s1 = sld [smem:[#allocation13_spill]] }
  0x1e   : > { %s324_s12 = scalar_select %p323_p0, %s1197_s0, 7 }
  0x1f   : > { %s1245_s25 = scalar_lea.vmem [#allocation9], %s920_s11  ;;  %330 = sbr.rel (%p916_p9) target bundleno = 41 (0x29), region = 60 }
  0x20   : > { %s921_s17 = sshll.u32 %s324_s12, 3 }
  0x23   : > { %s1243_s24 = scalar_lea.vmem %s1441_s1, %s921_s17 }
  0x24   : > { %v332_v0 = vld [vmem:[%s1243_s24] sm:$0xff]  ;;  %v1121_v2 = vmov 0.0  }
  0x25   : > { %v334_v1 = vld [vmem:[%s1430_s2] sm:$0xff]  ;;  %331 = vst [vmem:[%s1245_s25] sm:$0xff] %v1121_v2 }
  0x26   : > { %v336_v3 = vld [vmem:[%s1431_s3] sm:$0xff]  ;;  %333 = vst [vmem:[#allocation2] sm:$0xff] %v332_v0 }
  0x27   : > { %335 = vst [vmem:[#allocation2 + $0x8] sm:$0xff] %v334_v1 }
  0x28   : > { %337 = vst [vmem:[#allocation3] sm:$0xff] %v336_v3 }
  0x29 PF: > { %p338_p1 = scmp.gt.s32.totalorder %s1197_s0, 0  ;;  %p923_p2 = scmp.le.s32.totalorder %s1197_s0, 0 }
  0x2b   : > { %341 = sbr.rel (%p923_p2) target bundleno = 409 (0x199), region = 64 }
  0x30   : > { %v405_v4 = vld [vmem:[#allocation6 + $0x1e8] sm:$0xff]  ;;  %v404_v7 = vld [vmem:[#allocation6 + $0x1e0] sm:$0xff]  ;;  %v407_v1 = vld [vmem:[#allocation6 + $0x1f8] sm:$0xff] }
  0x31   : > { %v401_v5 = vld [vmem:[#allocation6 + $0x1c8] sm:$0xff]  ;;  %522 = vmatpush.msra.mxu2 %v405_v4  ;;  %482 = vmatpush.msra.mxu0 %v404_v7  ;;  %v400_v10 = vld [vmem:[#allocation6 + $0x1c0] sm:$0xff]  ;;  %v471_v4 = vld [vmem:[#allocation6 + $0x3f8] sm:$0xff] }
  0x32   : > { %v469_v6 = vld [vmem:[#allocation6 + $0x3e8] sm:$0xff]  ;;  %v468_v11 = vld [vmem:[#allocation6 + $0x3e0] sm:$0xff] }
  0x33   : > { %542 = vmatpush.msra.mxu3 %v469_v6  ;;  %v465_v8 = vld [vmem:[#allocation6 + $0x3c8] sm:$0xff]  ;;  %523 = vmatpush.msra.mxu2 %v401_v5  ;;  %v396_v13 = vld [vmem:[#allocation6 + $0x1a0] sm:$0xff]  ;;  %v403_v5 = vld [vmem:[#allocation6 + $0x1d8] sm:$0xff] }
  0x34   : > { %v397_v9 = vld [vmem:[#allocation6 + $0x1a8] sm:$0xff]  ;;  %v464_v14 = vld [vmem:[#allocation6 + $0x3c0] sm:$0xff]  ;;  %483 = vmatpush.msra.mxu0 %v400_v10  ;;  %502 = vmatpush.msra.mxu1 %v468_v11  ;;  %v406_v6 = vld [vmem:[#allocation6 + $0x1f0] sm:$0xff] }
  0x35   : > { %543 = vmatpush.msra.mxu3 %v465_v8  ;;  %v461_v12 = vld [vmem:[#allocation6 + $0x3a8] sm:$0xff]  ;;  %524 = vmatpush.msra.mxu2 %v397_v9  ;;  %v392_v17 = vld [vmem:[#allocation6 + $0x180] sm:$0xff]  ;;  %v467_v8 = vld [vmem:[#allocation6 + $0x3d8] sm:$0xff] }
  0x36   : > { %v393_v15 = vld [vmem:[#allocation6 + $0x188] sm:$0xff]  ;;  %v460_v18 = vld [vmem:[#allocation6 + $0x3a0] sm:$0xff]  ;;  %484 = vmatpush.msra.mxu0 %v396_v13  ;;  %503 = vmatpush.msra.mxu1 %v464_v14  ;;  %v399_v9 = vld [vmem:[#allocation6 + $0x1b8] sm:$0xff] }
  0x37   : > { %v457_v16 = vld [vmem:[#allocation6 + $0x388] sm:$0xff]  ;;  %544 = vmatpush.msra.mxu3 %v461_v12  ;;  %525 = vmatpush.msra.mxu2 %v393_v15  ;;  %v388_v21 = vld [vmem:[#allocation6 + $0x160] sm:$0xff]  ;;  %v402_v10 = vld [vmem:[#allocation6 + $0x1d0] sm:$0xff] }
  0x38   : > { %v389_v19 = vld [vmem:[#allocation6 + $0x168] sm:$0xff]  ;;  %v456_v22 = vld [vmem:[#allocation6 + $0x380] sm:$0xff]  ;;  %485 = vmatpush.msra.mxu0 %v392_v17  ;;  %504 = vmatpush.msra.mxu1 %v460_v18  ;;  %v470_v11 = vld [vmem:[#allocation6 + $0x3f0] sm:$0xff] }
  0x39   : > { %v453_v20 = vld [vmem:[#allocation6 + $0x368] sm:$0xff]  ;;  %545 = vmatpush.msra.mxu3 %v457_v16  ;;  %526 = vmatpush.msra.mxu2 %v389_v19  ;;  %v384_v25 = vld [vmem:[#allocation6 + $0x140] sm:$0xff]  ;;  %v463_v12 = vld [vmem:[#allocation6 + $0x3b8] sm:$0xff] }
  0x3a   : > { %v385_v23 = vld [vmem:[#allocation6 + $0x148] sm:$0xff]  ;;  %v452_v26 = vld [vmem:[#allocation6 + $0x360] sm:$0xff]  ;;  %486 = vmatpush.msra.mxu0 %v388_v21  ;;  %505 = vmatpush.msra.mxu1 %v456_v22  ;;  %v395_v13 = vld [vmem:[#allocation6 + $0x198] sm:$0xff] }
  0x3b   : > { %v449_v24 = vld [vmem:[#allocation6 + $0x348] sm:$0xff]  ;;  %546 = vmatpush.msra.mxu3 %v453_v20  ;;  %527 = vmatpush.msra.mxu2 %v385_v23  ;;  %v380_v29 = vld [vmem:[#allocation6 + $0x120] sm:$0xff]  ;;  %v398_v14 = vld [vmem:[#allocation6 + $0x1b0] sm:$0xff] }
  0x3c   : > { %v381_v27 = vld [vmem:[#allocation6 + $0x128] sm:$0xff]  ;;  %v448_v30 = vld [vmem:[#allocation6 + $0x340] sm:$0xff]  ;;  %487 = vmatpush.msra.mxu0 %v384_v25  ;;  %506 = vmatpush.msra.mxu1 %v452_v26  ;;  %v466_v16 = vld [vmem:[#allocation6 + $0x3d0] sm:$0xff] }
  0x3d   : > { %v445_v28 = vld [vmem:[#allocation6 + $0x328] sm:$0xff]  ;;  %547 = vmatpush.msra.mxu3 %v449_v24  ;;  %528 = vmatpush.msra.mxu2 %v381_v27  ;;  %v376_v33 = vld [vmem:[#allocation6 + $0x100] sm:$0xff]  ;;  %v391_v17 = vld [vmem:[#allocation6 + $0x178] sm:$0xff] }
  0x3e   : > { %v377_v31 = vld [vmem:[#allocation6 + $0x108] sm:$0xff]  ;;  %v444_v34 = vld [vmem:[#allocation6 + $0x320] sm:$0xff]  ;;  %488 = vmatpush.msra.mxu0 %v380_v29  ;;  %507 = vmatpush.msra.mxu1 %v448_v30  ;;  %v459_v18 = vld [vmem:[#allocation6 + $0x398] sm:$0xff] }
  0x3f   : > { %v441_v32 = vld [vmem:[#allocation6 + $0x308] sm:$0xff]  ;;  %548 = vmatpush.msra.mxu3 %v445_v28  ;;  %529 = vmatpush.msra.mxu2 %v377_v31  ;;  %v372_v37 = vld [vmem:[#allocation6 + $0xe0] sm:$0xff]  ;;  %v1261_v19 = vld [vmem:[#allocation2 + $0x8] sm:$0xff] }
  0x40   : > { %v373_v35 = vld [vmem:[#allocation6 + $0xe8] sm:$0xff]  ;;  %v440_v38 = vld [vmem:[#allocation6 + $0x300] sm:$0xff]  ;;  %489 = vmatpush.msra.mxu0 %v376_v33  ;;  %508 = vmatpush.msra.mxu1 %v444_v34  ;;  %v394_v20 = vld [vmem:[#allocation6 + $0x190] sm:$0xff] }
  0x41   : > { %v437_v36 = vld [vmem:[#allocation6 + $0x2e8] sm:$0xff]  ;;  %549 = vmatpush.msra.mxu3 %v441_v32  ;;  %530 = vmatpush.msra.mxu2 %v373_v35  ;;  %v368_v41 = vld [vmem:[#allocation6 + $0xc0] sm:$0xff]  ;;  %v462_v21 = vld [vmem:[#allocation6 + $0x3b0] sm:$0xff] }
  0x42   : > { %v369_v39 = vld [vmem:[#allocation6 + $0xc8] sm:$0xff]  ;;  %v436_v42 = vld [vmem:[#allocation6 + $0x2e0] sm:$0xff]  ;;  %490 = vmatpush.msra.mxu0 %v372_v37  ;;  %509 = vmatpush.msra.mxu1 %v440_v38  ;;  %v387_v22 = vld [vmem:[#allocation6 + $0x158] sm:$0xff] }
  0x43   : > { %v433_v40 = vld [vmem:[#allocation6 + $0x2c8] sm:$0xff]  ;;  %550 = vmatpush.msra.mxu3 %v437_v36  ;;  %531 = vmatpush.msra.mxu2 %v369_v39  ;;  %v364_v45 = vld [vmem:[#allocation6 + $0xa0] sm:$0xff]  ;;  %v455_v23 = vld [vmem:[#allocation6 + $0x378] sm:$0xff] }
  0x44   : > { %v365_v43 = vld [vmem:[#allocation6 + $0xa8] sm:$0xff]  ;;  %v432_v46 = vld [vmem:[#allocation6 + $0x2c0] sm:$0xff]  ;;  %491 = vmatpush.msra.mxu0 %v368_v41  ;;  %510 = vmatpush.msra.mxu1 %v436_v42  ;;  %v390_v24 = vld [vmem:[#allocation6 + $0x170] sm:$0xff] }
  0x45   : > { %v429_v44 = vld [vmem:[#allocation6 + $0x2a8] sm:$0xff]  ;;  %551 = vmatpush.msra.mxu3 %v433_v40  ;;  %532 = vmatpush.msra.mxu2 %v365_v43  ;;  %v360_v49 = vld [vmem:[#allocation6 + $0x80] sm:$0xff]  ;;  %v458_v25 = vld [vmem:[#allocation6 + $0x390] sm:$0xff] }
  0x46   : > { %v361_v47 = vld [vmem:[#allocation6 + $0x88] sm:$0xff]  ;;  %v428_v50 = vld [vmem:[#allocation6 + $0x2a0] sm:$0xff]  ;;  %492 = vmatpush.msra.mxu0 %v364_v45  ;;  %511 = vmatpush.msra.mxu1 %v432_v46  ;;  %v383_v26 = vld [vmem:[#allocation6 + $0x138] sm:$0xff] }
  0x47   : > { %v425_v48 = vld [vmem:[#allocation6 + $0x288] sm:$0xff]  ;;  %552 = vmatpush.msra.mxu3 %v429_v44  ;;  %533 = vmatpush.msra.mxu2 %v361_v47  ;;  %v356_v53 = vld [vmem:[#allocation6 + $0x60] sm:$0xff]  ;;  %v451_v27 = vld [vmem:[#allocation6 + $0x358] sm:$0xff] }
  0x48   : > { %v357_v51 = vld [vmem:[#allocation6 + $0x68] sm:$0xff]  ;;  %v424_v54 = vld [vmem:[#allocation6 + $0x280] sm:$0xff]  ;;  %493 = vmatpush.msra.mxu0 %v360_v49  ;;  %512 = vmatpush.msra.mxu1 %v428_v50  ;;  %v386_v28 = vld [vmem:[#allocation6 + $0x150] sm:$0xff] }
  0x49   : > { %v421_v52 = vld [vmem:[#allocation6 + $0x268] sm:$0xff]  ;;  %553 = vmatpush.msra.mxu3 %v425_v48  ;;  %534 = vmatpush.msra.mxu2 %v357_v51  ;;  %v352_v57 = vld [vmem:[#allocation6 + $0x40] sm:$0xff]  ;;  %v454_v29 = vld [vmem:[#allocation6 + $0x370] sm:$0xff] }
  0x4a   : > { %v353_v55 = vld [vmem:[#allocation6 + $0x48] sm:$0xff]  ;;  %v420_v58 = vld [vmem:[#allocation6 + $0x260] sm:$0xff]  ;;  %494 = vmatpush.msra.mxu0 %v356_v53  ;;  %513 = vmatpush.msra.mxu1 %v424_v54  ;;  %v379_v30 = vld [vmem:[#allocation6 + $0x118] sm:$0xff] }
  0x4b   : > { %v417_v56 = vld [vmem:[#allocation6 + $0x248] sm:$0xff]  ;;  %554 = vmatpush.msra.mxu3 %v421_v52  ;;  %535 = vmatpush.msra.mxu2 %v353_v55  ;;  %v348_v61 = vld [vmem:[#allocation6 + $0x20] sm:$0xff]  ;;  %v447_v31 = vld [vmem:[#allocation6 + $0x338] sm:$0xff] }
  0x4c   : > { %v349_v59 = vld [vmem:[#allocation6 + $0x28] sm:$0xff]  ;;  %v416_v62 = vld [vmem:[#allocation6 + $0x240] sm:$0xff]  ;;  %495 = vmatpush.msra.mxu0 %v352_v57  ;;  %514 = vmatpush.msra.mxu1 %v420_v58  ;;  %v382_v32 = vld [vmem:[#allocation6 + $0x130] sm:$0xff] }
  0x4d   : > { %v413_v60 = vld [vmem:[#allocation6 + $0x228] sm:$0xff]  ;;  %555 = vmatpush.msra.mxu3 %v417_v56  ;;  %536 = vmatpush.msra.mxu2 %v349_v59  ;;  %v344_v2 = vld [vmem:[#allocation6] sm:$0xff]  ;;  %v450_v33 = vld [vmem:[#allocation6 + $0x350] sm:$0xff] }
  0x4e   : > { %v345_v63 = vld [vmem:[#allocation6 + $0x8] sm:$0xff]  ;;  %496 = vmatpush.msra.mxu0 %v348_v61  ;;  %515 = vmatpush.msra.mxu1 %v416_v62  ;;  %v412_v3 = vld [vmem:[#allocation6 + $0x220] sm:$0xff]  ;;  %v375_v34 = vld [vmem:[#allocation6 + $0xf8] sm:$0xff] }
  0x4f   : > { %v409_v0 = vld [vmem:[#allocation6 + $0x208] sm:$0xff]  ;;  %556 = vmatpush.msra.mxu3 %v413_v60  ;;  %537 = vmatpush.msra.mxu2 %v345_v63  ;;  %v408_v7 = vld [vmem:[#allocation6 + $0x200] sm:$0xff]  ;;  %v443_v35 = vld [vmem:[#allocation6 + $0x318] sm:$0xff] }
  0x50   : > { %497 = vmatpush.msra.mxu0 %v344_v2  ;;  %516 = vmatpush.msra.mxu1 %v412_v3  ;;  %v1259_v15 = vld [vmem:[#allocation2] sm:$0xff]  ;;  %v378_v36 = vld [vmem:[#allocation6 + $0x110] sm:$0xff]  ;;  %v371_v38 = vld [vmem:[#allocation6 + $0xd8] sm:$0xff] }
  0x51   : > { %557 = vmatpush.msra.mxu3 %v409_v0  ;;  %602 = vmatpush.msrb.mxu2 %v407_v1  ;;  %v446_v37 = vld [vmem:[#allocation6 + $0x330] sm:$0xff]  ;;  %v439_v39 = vld [vmem:[#allocation6 + $0x2f8] sm:$0xff] }
  0x52   : > { %562 = vmatpush.msrb.mxu0 %v406_v6  ;;  %517 = vmatpush.msra.mxu1 %v408_v7  ;;  %v374_v40 = vld [vmem:[#allocation6 + $0xf0] sm:$0xff]  ;;  %v367_v42 = vld [vmem:[#allocation6 + $0xb8] sm:$0xff]  ;;  %v1274_v6 = vld [vmem:[%s1433_s5] sm:$0xf] }
  0x53   : > { %622 = vmatpush.msrb.mxu3 %v471_v4  ;;  %603 = vmatpush.msrb.mxu2 %v403_v5  ;;  %v442_v41 = vld [vmem:[#allocation6 + $0x310] sm:$0xff]  ;;  %v435_v43 = vld [vmem:[#allocation6 + $0x2d8] sm:$0xff]  ;;  %v474_v7 = vperm.slane %v1274_v6, 0 }
  0x54   : > { %563 = vmatpush.msrb.mxu0 %v402_v10  ;;  %582 = vmatpush.msrb.mxu1 %v470_v11  ;;  %v370_v44 = vld [vmem:[#allocation6 + $0xd0] sm:$0xff]  ;;  %v363_v46 = vld [vmem:[#allocation6 + $0x98] sm:$0xff] }
  0x55   : > { %623 = vmatpush.msrb.mxu3 %v467_v8  ;;  %604 = vmatpush.msrb.mxu2 %v399_v9  ;;  %v438_v45 = vld [vmem:[#allocation6 + $0x2f0] sm:$0xff]  ;;  %v431_v47 = vld [vmem:[#allocation6 + $0x2b8] sm:$0xff]  ;;  %v475_v8 = vperm.slane %v1274_v6, 1  ;;  %v721_v9 = vld [vmem:[%s1434_s6 + $0x78] sm:$0xff] }
  0x56   : > { %564 = vmatpush.msrb.mxu0 %v398_v14  ;;  %538 = vmatmul.f32.vlgmr.msra.gmra.mxu2 %v1259_v15  ;;  %v366_v48 = vld [vmem:[#allocation6 + $0xb0] sm:$0xff]  ;;  %v359_v50 = vld [vmem:[#allocation6 + $0x78] sm:$0xff] }
  0x57   : > { %624 = vmatpush.msrb.mxu3 %v463_v12  ;;  %605 = vmatpush.msrb.mxu2 %v395_v13  ;;  %v434_v49 = vld [vmem:[#allocation6 + $0x2d0] sm:$0xff]  ;;  %v427_v51 = vld [vmem:[#allocation6 + $0x298] sm:$0xff] }
  0x58   : > { %583 = vmatpush.msrb.mxu1 %v466_v16  ;;  %558 = vmatmul.f32.vlgmr.msra.gmra.mxu3 %v1261_v19  ;;  %v362_v52 = vld [vmem:[#allocation6 + $0x90] sm:$0xff]  ;;  %v355_v54 = vld [vmem:[#allocation6 + $0x58] sm:$0xff] }
  0x59   : > { %606 = vmatpush.msrb.mxu2 %v391_v17  ;;  %625 = vmatpush.msrb.mxu3 %v459_v18  ;;  %v430_v53 = vld [vmem:[#allocation6 + $0x2b0] sm:$0xff]  ;;  %v423_v55 = vld [vmem:[#allocation6 + $0x278] sm:$0xff] }
  0x5a   : > { %565 = vmatpush.msrb.mxu0 %v394_v20  ;;  %584 = vmatpush.msrb.mxu1 %v462_v21  ;;  %v358_v56 = vld [vmem:[#allocation6 + $0x70] sm:$0xff]  ;;  %v351_v58 = vld [vmem:[#allocation6 + $0x38] sm:$0xff] }
  0x5b   : > { %607 = vmatpush.msrb.mxu2 %v387_v22  ;;  %626 = vmatpush.msrb.mxu3 %v455_v23  ;;  %v426_v57 = vld [vmem:[#allocation6 + $0x290] sm:$0xff]  ;;  %v419_v59 = vld [vmem:[#allocation6 + $0x258] sm:$0xff]  ;;  %v717_v22 = vld [vmem:[%s1434_s6 + $0x58] sm:$0xff] }
  0x5c   : > { %566 = vmatpush.msrb.mxu0 %v390_v24  ;;  %585 = vmatpush.msrb.mxu1 %v458_v25  ;;  %v354_v60 = vld [vmem:[#allocation6 + $0x50] sm:$0xff]  ;;  %v347_v62 = vld [vmem:[#allocation6 + $0x18] sm:$0xff] }
  0x5d   : > { %608 = vmatpush.msrb.mxu2 %v383_v26  ;;  %627 = vmatpush.msrb.mxu3 %v451_v27  ;;  %v422_v61 = vld [vmem:[#allocation6 + $0x270] sm:$0xff]  ;;  %v415_v63 = vld [vmem:[#allocation6 + $0x238] sm:$0xff]  ;;  %v714_v26 = vld [vmem:[%s1434_s6 + $0x40] sm:$0xff] }
  0x5e   : > { %498 = vmatmul.f32.vlgmr.msra.gmra.mxu0 %v1259_v15  ;;  %586 = vmatpush.msrb.mxu1 %v454_v29  ;;  %v350_v0 = vld [vmem:[#allocation6 + $0x30] sm:$0xff]  ;;  %v411_v2 = vld [vmem:[#allocation6 + $0x218] sm:$0xff] }
  0x5f   : > { %567 = vmatpush.msrb.mxu0 %v386_v28  ;;  %609 = vmatpush.msrb.mxu2 %v379_v30  ;;  %v418_v1 = vld [vmem:[#allocation6 + $0x250] sm:$0xff]  ;;  %v720_v10 = vld [vmem:[%s1434_s6 + $0x70] sm:$0xff]  ;;  %v713_v28 = vld [vmem:[%s1434_s6 + $0x38] sm:$0xff] }
  0x60   : > { %628 = vmatpush.msrb.mxu3 %v447_v31  ;;  %518 = vmatmul.f32.vlgmr.msra.gmra.mxu1 %v1261_v19  ;;  %v346_v3 = vld [vmem:[#allocation6 + $0x10] sm:$0xff]  ;;  %v716_v24 = vld [vmem:[%s1434_s6 + $0x50] sm:$0xff] }
  0x61   : > { %568 = vmatpush.msrb.mxu0 %v382_v32  ;;  %587 = vmatpush.msrb.mxu1 %v450_v33  ;;  %v414_v4 = vld [vmem:[#allocation6 + $0x230] sm:$0xff]  ;;  %v712_v32 = vld [vmem:[%s1434_s6 + $0x30] sm:$0xff] }
  0x62   : > { %610 = vmatpush.msrb.mxu2 %v375_v34  ;;  %629 = vmatpush.msrb.mxu3 %v443_v35  ;;  %v410_v5 = vld [vmem:[#allocation6 + $0x210] sm:$0xff]  ;;  %v710_v34 = vld [vmem:[%s1434_s6 + $0x20] sm:$0xff]  ;;  %v709_v35 = vld [vmem:[%s1434_s6 + $0x18] sm:$0xff] }
  0x63   : > { %569 = vmatpush.msrb.mxu0 %v378_v36  ;;  %588 = vmatpush.msrb.mxu1 %v446_v37  ;;  %v715_v25 = vld [vmem:[%s1434_s6 + $0x48] sm:$0xff]  ;;  %v476_v36 = vperm.slane %v1274_v6, 2  ;;  %v708_v37 = vld [vmem:[%s1434_s6 + $0x10] sm:$0xff] }
  0x64   : > { %611 = vmatpush.msrb.mxu2 %v371_v38  ;;  %630 = vmatpush.msrb.mxu3 %v439_v39  ;;  %v711_v33 = vld [vmem:[%s1434_s6 + $0x28] sm:$0xff] }
  0x65   : > { %570 = vmatpush.msrb.mxu0 %v374_v40  ;;  %589 = vmatpush.msrb.mxu1 %v442_v41 }
  0x66   : > { %612 = vmatpush.msrb.mxu2 %v367_v42  ;;  %631 = vmatpush.msrb.mxu3 %v435_v43  ;;  %v477_v42 = vperm.slane %v1274_v6, 3  ;;  %v707_v43 = vld [vmem:[%s1434_s6 + $0x8] sm:$0xff] }
  0x67   : > { %571 = vmatpush.msrb.mxu0 %v370_v44  ;;  %590 = vmatpush.msrb.mxu1 %v438_v45 }
  0x68   : > { %613 = vmatpush.msrb.mxu2 %v363_v46  ;;  %632 = vmatpush.msrb.mxu3 %v431_v47 }
  0x69   : > { %572 = vmatpush.msrb.mxu0 %v366_v48  ;;  %591 = vmatpush.msrb.mxu1 %v434_v49 }
  0x6a   : > { %614 = vmatpush.msrb.mxu2 %v359_v50  ;;  %633 = vmatpush.msrb.mxu3 %v427_v51  ;;  %v706_v51 = vld [vmem:[%s1434_s6] sm:$0xff] }
  0x6b   : > { %573 = vmatpush.msrb.mxu0 %v362_v52  ;;  %592 = vmatpush.msrb.mxu1 %v430_v53 }
  0x6c   : > { %615 = vmatpush.msrb.mxu2 %v355_v54  ;;  %634 = vmatpush.msrb.mxu3 %v423_v55 }
  0x6d   : > { %574 = vmatpush.msrb.mxu0 %v358_v56  ;;  %593 = vmatpush.msrb.mxu1 %v426_v57 }
  0x6e   : > { %616 = vmatpush.msrb.mxu2 %v351_v58  ;;  %635 = vmatpush.msrb.mxu3 %v419_v59 }
  0x6f   : > { %575 = vmatpush.msrb.mxu0 %v354_v60  ;;  %594 = vmatpush.msrb.mxu1 %v422_v61 }
  0x70   : > { %617 = vmatpush.msrb.mxu2 %v347_v62  ;;  %636 = vmatpush.msrb.mxu3 %v415_v63 }
  0x71   : > { %576 = vmatpush.msrb.mxu0 %v350_v0  ;;  %595 = vmatpush.msrb.mxu1 %v418_v1 }
  0x72   : > { %618 = vmatmul.f32.vlgmr.msrb.gmra.mxu2 %v1259_v15  ;;  %637 = vmatpush.msrb.mxu3 %v411_v2  ;;  %v700_v2 = vld [vmem:[#allocation3] sm:$0xff] }
  0x73   : > { %577 = vmatpush.msrb.mxu0 %v346_v3  ;;  %596 = vmatpush.msrb.mxu1 %v414_v4 }
  0x74   : > { %638 = vmatmul.f32.vlgmr.msrb.gmra.mxu3 %v1261_v19  ;;  %578 = vmatmul.f32.vlgmr.msrb.gmra.mxu0 %v1259_v15  ;;  %v719_v15 = vld [vmem:[%s1434_s6 + $0x68] sm:$0xff] }
  0x75   : > { %597 = vmatpush.msrb.mxu1 %v410_v5  ;;  %726 = vmatpush.msra.mxu0 %v721_v9 }
  0x76   : > { %598 = vmatmul.f32.vlgmr.msrb.gmra.mxu1 %v1261_v19  ;;  %v718_v19 = vld [vmem:[%s1434_s6 + $0x60] sm:$0xff] }
  0x77   : > { %727 = vmatpush.msra.mxu0 %v720_v10 }
  0x79   : > { %728 = vmatpush.msra.mxu0 %v719_v15 }
  0x7b   : > { %729 = vmatpush.msra.mxu0 %v718_v19 }
  0x7d   : > { %730 = vmatpush.msra.mxu0 %v717_v22 }
  0x7f   : > { %731 = vmatpush.msra.mxu0 %v716_v24 }
  0x81   : > { %732 = vmatpush.msra.mxu0 %v715_v25 }
  0x83   : > { %733 = vmatpush.msra.mxu0 %v714_v26  ;;  %v988_v26 = vld [vmem:[%s1435_s7] ss:$0 sm:$0xff] }
  0x85   : > { %734 = vmatpush.msra.mxu0 %v713_v28 }
  0x87   : > { %735 = vmatpush.msra.mxu0 %v712_v32 }
  0x89   : > { %736 = vmatpush.msra.mxu0 %v711_v33 }
  0x8b   : > { %737 = vmatpush.msra.mxu0 %v710_v34 }
  0x8d   : > { %738 = vmatpush.msra.mxu0 %v709_v35 }
  0x8f   : > { %739 = vmatpush.msra.mxu0 %v708_v37 }
  0x91   : > { %740 = vmatpush.msra.mxu0 %v707_v43 }
  0x93   : > { %741 = vmatpush.msra.mxu0 %v706_v51 }
  0xd9   : > { %v539_v12 = vpop.f32.mrf.mxu2 }
  0xda   : > { %v540_v14 = vadd.f32 %v539_v12, %v475_v8 }
  0xdb   : > { %v499_v11 = vpop.f32.mrf.mxu0  ;;  %v559_v16 = vpop.f32.mrf.mxu3 }
  0xdc   : > { %v500_v13 = vadd.f32 %v499_v11, %v474_v7  ;;  %v560_v18 = vadd.f32 %v559_v16, %v540_v14 }
  0xdd   : > { %v519_v17 = vpop.f32.mrf.mxu1 }
  0xde   : > { %v520_v20 = vadd.f32 %v519_v17, %v500_v13  ;;  %v925_v21 = vmul.f32 -1.442695, %v560_v18 }
  0xe0   : > { %v924_v23 = vmul.f32 -1.442695, %v520_v20  ;;  %989 = vpow2.f32 %v925_v21 }
  0xe2   : > { %991 = vpow2.f32 %v924_v23 }
  0xe6   : > { %v990_v27 = vpop.eup %989 }
  0xe7   : > { %v664_v30 = vadd.f32 1.0, %v990_v27 }
  0xe8   : > { %v992_v29 = vpop.eup %991 }
  0xe9   : > { %v645_v31 = vadd.f32 1.0, %v992_v29  ;;  %993 = vrcp.f32 %v664_v30  ;;  %vm670_vm0 = vweird.f32 %v664_v30  ;;  %v676_v45 = vand.u32 2147483648, %v664_v30 }
  0xea   : > { %v674_v47 = vand.u32 2147483647, %v664_v30 }
  0xeb   : > { %995 = vrcp.f32 %v645_v31  ;;  %vm651_vm2 = vweird.f32 %v645_v31  ;;  %v657_v50 = vand.u32 2147483648, %v645_v31  ;;  %v655_v54 = vand.u32 2147483647, %v645_v31 }
  0xec   : > { %v677_v59 = vor.u32 1.1754944e-38, %v676_v45  ;;  %vm675_vm6 = vcmp.eq.f32.partialorder %v674_v47, 8.507059e+37 }
  0xed   : > { %v658_v62 = vor.u32 1.1754944e-38, %v657_v50  ;;  %vm656_vm7 = vcmp.eq.f32.partialorder %v655_v54, 8.507059e+37 }
  0xef   : > { %v994_v38 = vpop.eup %993 }
  0xf0   : > { %v666_v40 = vmul.f32 %v994_v38, %v664_v30  ;;  %vm671_vm1 = vweird.f32 %v994_v38 }
  0xf1   : > { %v996_v39 = vpop.eup %995  ;;  %v579_v41 = vpop.f32.mrf.mxu0  ;;  %vm1329_vm4 = vmor %vm670_vm0, %vm671_vm1 }
  0xf2   : > { %v647_v44 = vmul.f32 %v996_v39, %v645_v31  ;;  %v580_v46 = vadd.f32 %v579_v41, %v476_v36  ;;  %v667_v48 = vsub.f32 1.0, %v666_v40  ;;  %vm652_vm3 = vweird.f32 %v996_v39 }
  0xf3   : > { %v599_v49 = vpop.f32.mrf.mxu1  ;;  %vm653_vm5 = vmor %vm651_vm2, %vm652_vm3 }
  0xf4   : > { %v648_v52 = vsub.f32 1.0, %v647_v44  ;;  %v600_v53 = vadd.f32 %v599_v49, %v580_v46  ;;  %v668_v56 = vmul.f32 %v994_v38, %v667_v48 }
  0xf5   : > { %v619_v55 = vpop.f32.mrf.mxu2 }
  0xf6   : > { %v620_v57 = vadd.f32 %v619_v55, %v477_v42  ;;  %v649_v60 = vmul.f32 %v996_v39, %v648_v52  ;;  %997 = vtanh.f32 %v600_v53  ;;  %v669_v63 = vadd.f32 %v994_v38, %v668_v56 }
  0xf7   : > { %v639_v61 = vpop.f32.mrf.mxu3 }
  0xf8   : > { %v640_v0 = vadd.f32 %v639_v61, %v620_v57  ;;  %v650_v1 = vadd.f32 %v996_v39, %v649_v60  ;;  %v673_v3 = vsel %vm1329_vm4, %v994_v38, %v669_v63 }
  0xf9   : > { %v678_v6 = vsel %vm675_vm6, %v677_v59, %v673_v3 }
  0xfa   : > { %v926_v4 = vmul.f32 -1.442695, %v640_v0  ;;  %v654_v5 = vsel %vm653_vm5, %v996_v39, %v650_v1  ;;  %v701_v8 = vmul.f32 %v700_v2, %v678_v6 }
  0xfb   : > { %v659_v7 = vsel %vm656_vm7, %v658_v62, %v654_v5 }
  0xfc   : > { %999 = vpow2.f32 %v926_v4  ;;  %v998_v9 = vpop.eup %997 }
  0xfd   : > { %v702_v10 = vmul.f32 %v998_v9, %v659_v7 }
  0xff   : > { %v703_v11 = vadd.f32 %v702_v10, %v701_v8 }
 0x101   : > { %747 = vst [vmem:[#allocation3] sm:$0xff] %v703_v11 }
 0x102   : > { %v1000_v12 = vpop.eup %999 }
 0x103   : > { %v684_v13 = vadd.f32 1.0, %v1000_v12 }
 0x105   : > { %1001 = vrcp.f32 %v684_v13  ;;  %v696_v17 = vand.u32 2147483648, %v684_v13  ;;  %v694_v19 = vand.u32 2147483647, %v684_v13  ;;  %vm690_vm9 = vweird.f32 %v684_v13 }
 0x106   : > { %1003 = vtanh.f32 %v703_v11 }
 0x107   : > { %v697_v21 = vor.u32 1.1754944e-38, %v696_v17  ;;  %vm695_vm11 = vcmp.eq.f32.partialorder %v694_v19, 8.507059e+37 }
 0x10b   : > { %v1002_v14 = vpop.eup %1001 }
 0x10c   : > { %v686_v15 = vmul.f32 %v1002_v14, %v684_v13  ;;  %vm691_vm8 = vweird.f32 %v1002_v14  ;;  %v1004_v23 = vpop.eup %1003 }
 0x10d   : > { %vm692_vm10 = vmor %vm690_vm9, %vm691_vm8 }
 0x10e   : > { %v687_v16 = vsub.f32 1.0, %v686_v15 }
 0x110   : > { %v688_v18 = vmul.f32 %v1002_v14, %v687_v16 }
 0x112   : > { %v689_v20 = vadd.f32 %v1002_v14, %v688_v18 }
 0x114   : > { %v693_v22 = vsel %vm692_vm10, %v1002_v14, %v689_v20 }
 0x115   : > { %v698_v24 = vsel %vm695_vm11, %v697_v21, %v693_v22 }
 0x116   : > { %v705_v25 = vmul.f32 %v1004_v23, %v698_v24 }
 0x118   : > { %742 = vmatmul.f32.vlgmr.msra.gmra.mxu0 %v705_v25  ;;  %748 = vst [vmem:[#allocation2 + $0x8] sm:$0xff] %v705_v25 }
 0x195   : > { %v743_v27 = vpop.f32.mrf.mxu0 }
 0x196   : > { %v744_v28 = vadd.f32 %v988_v26, %v743_v27 }
 0x198   : > { %746 = vst [vmem:[%s1245_s25] sm:$0xff] %v744_v28 }
 0x199 PF: > { %s749_s26 = sadd.s32 1, %s1197_s0  ;;  %s753_s27 = sld [smem:[#allocation5 + %s1197_s0]] }
 0x19a   : > { %p750_p3 = scmp.lt.s32.totalorder %s749_s26, 8 }
 0x19c   : > { %p751_p4 = pnand %p750_p3, %p338_p1 }
 0x19e   : > { %p752_p7 = pneg %p751_p4 }
 0x19f   : > { %p754_p8 = scmp.ne.s32.totalorder %s753_s27, 0  ;;  %p757_p9 = scmp.eq.s32.totalorder %s753_s27, 0 }
 0x1a1   : > { %p755_p10 = pnand %p754_p8, %p752_p7  ;;  %p758_p11 = pnand %p757_p9, %p752_p7 }
 0x1a3   : > { %761 = sbr.rel (%p755_p10) target bundleno = 426 (0x1aa), region = 68 }
 0x1a8   : > { %v762_v29 = vld [vmem:[%s1243_s24] sm:$0xff] }
 0x1a9   : > { %763 = vst [vmem:[#allocation2] sm:$0xff] %v762_v29 }
 0x1aa PF: > { %765 = sbr.rel (%p758_p11) target bundleno = 920 (0x398), region = 72 }
 0x1af   : > { %v766_v30 = vld [vmem:[%s1245_s25] sm:$0xff]  ;;  %v769_v31 = vlaneseq  ;;  %v804_v38 = vld [vmem:[%s1436_s8 + $0x70] sm:$0xff]  ;;  %v803_v39 = vld [vmem:[%s1436_s8 + $0x68] sm:$0xff]  ;;  %v1122_v62 = vmov 1.0  }
 0x1b0   : > { %767 = vmax.xlane.f32.xlu0 %v766_v30  ;;  %v805_v37 = vld [vmem:[%s1436_s8 + $0x78] sm:$0xff]  ;;  %v802_v40 = vld [vmem:[%s1436_s8 + $0x60] sm:$0xff]  ;;  %v800_v42 = vld [vmem:[%s1436_s8 + $0x50] sm:$0xff] }
 0x1b1   : > { %v770_v32 = vand.u32 127, %v769_v31  ;;  %806 = vmatpush.msra.mxu0 %v805_v37  ;;  %v801_v41 = vld [vmem:[%s1436_s8 + $0x58] sm:$0xff]  ;;  %v799_v43 = vld [vmem:[%s1436_s8 + $0x48] sm:$0xff]  ;;  %v798_v44 = vld [vmem:[%s1436_s8 + $0x40] sm:$0xff] }
 0x1b2   : > { %v797_v45 = vld [vmem:[%s1436_s8 + $0x38] sm:$0xff]  ;;  %v796_v46 = vld [vmem:[%s1436_s8 + $0x30] sm:$0xff]  ;;  %v795_v47 = vld [vmem:[%s1436_s8 + $0x28] sm:$0xff] }
 0x1b3   : > { %807 = vmatpush.msra.mxu0 %v804_v38  ;;  %v794_v48 = vld [vmem:[%s1436_s8 + $0x20] sm:$0xff]  ;;  %v793_v49 = vld [vmem:[%s1436_s8 + $0x18] sm:$0xff]  ;;  %v792_v54 = vld [vmem:[%s1436_s8 + $0x10] sm:$0xff] }
 0x1b4   : > { %v791_v55 = vld [vmem:[%s1436_s8 + $0x8] sm:$0xff]  ;;  %v790_v56 = vld [vmem:[%s1436_s8] sm:$0xff] }
 0x1b5   : > { %808 = vmatpush.msra.mxu0 %v803_v39 }
 0x1b7   : > { %809 = vmatpush.msra.mxu0 %v802_v40 }
 0x1b9   : > { %810 = vmatpush.msra.mxu0 %v801_v41 }
 0x1bb   : > { %811 = vmatpush.msra.mxu0 %v800_v42 }
 0x1bd   : > { %812 = vmatpush.msra.mxu0 %v799_v43 }
 0x1bf   : > { %813 = vmatpush.msra.mxu0 %v798_v44 }
 0x1c1   : > { %814 = vmatpush.msra.mxu0 %v797_v45 }
 0x1c3   : > { %815 = vmatpush.msra.mxu0 %v796_v46 }
 0x1c5   : > { %816 = vmatpush.msra.mxu0 %v795_v47 }
 0x1c7   : > { %817 = vmatpush.msra.mxu0 %v794_v48 }
 0x1c9   : > { %818 = vmatpush.msra.mxu0 %v793_v49 }
 0x1cb   : > { %819 = vmatpush.msra.mxu0 %v792_v54 }
 0x1cd   : > { %820 = vmatpush.msra.mxu0 %v791_v55 }
 0x1cf   : > { %821 = vmatpush.msra.mxu0 %v790_v56 }
 0x223   : > { %v768_v33 = vpop.xlane.xlu0 %767 }
 0x224   : > { %vm771_vm12 = vcmp.eq.f32.partialorder %v766_v30, %v768_v33 }
 0x225   : > { %v772_v34 = vsel %vm771_vm12, %v770_v32, 128 }
 0x226   : > { %v774_v35 = vshra.s32 %v772_v34, 16  ;;  %v773_v50 = vand.u32 65535, %v772_v34 }
 0x228   : > { %v776_v36 = vcvt.s32.f32 %v774_v35  ;;  %v775_v52 = vcvt.s32.f32 %v773_v50 }
 0x22a   : > { %777 = vmin.xlane.f32.xlu0 %v776_v36 }
 0x29d   : > { %v778_v51 = vpop.xlane.xlu0 %777 }
 0x29e   : > { %vm779_vm13 = vcmp.eq.f32.partialorder %v776_v36, %v778_v51  ;;  %v784_v57 = vcvt.f32.s32 %v778_v51 }
 0x29f   : > { %v780_v53 = vsel %vm779_vm13, %v775_v52, inf }
 0x2a0   : > { %781 = vmin.xlane.f32.xlu1 %v780_v53  ;;  %v785_v59 = vshll.u32 %v784_v57, 16 }
 0x313   : > { %v782_v58 = vpop.xlane.xlu1 %781 }
 0x314   : > { %v783_v60 = vcvt.f32.s32 %v782_v58 }
 0x316   : > { %v786_v61 = vadd.s32 %v785_v59, %v783_v60 }
 0x318   : > { %vm787_vm14 = vcmp.eq.s32.totalorder %v770_v32, %v786_v61 }
 0x319   : > { %928 = vmatmul.msk.f32.vlgmr.msra.gmra.mxu0 %vm787_vm14, %v1122_v62 }
 0x396   : > { %v823_v63 = vpop.f32.mrf.mxu0 }
 0x397   : > { %826 = vst [vmem:[#allocation2] sm:$0xff] %v823_v63 }
 0x398 PF: > { %s930_s27 = sshll.u32 %s1197_s0, 3  ;;  %s840_s24 = sshll.u32 %s1245_s25, 4  ;;  %s841_s24 = int_to_ptr.vmem [resolvable:$true] %s840_s24 }
 0x399   : > { %s838_s30 = scalar_lea.hbm %s1437_s9, %s930_s27  ;;  %s828_s12 = scalar_lea.sflag [#allocation8], %s320_s10 }
 0x39a   : > { %s842_s11 = sshll.u32 %s838_s30, 4  ;;  %s1067_s0 = scalar_lea.hbm %s1437_s9, 64  ;;  %s843_s11 = int_to_ptr.hbm [resolvable:$true] %s842_s11 }
 0x39b   : > { %s1061_s17 = sshra.s32 %s843_s11, 4  ;;  %s1062_s17 = int_to_ptr.hbm [resolvable:$true] %s1061_s17 }
 0x39c   : > { %s1063_s19 = scalar_lea.hbm %s1062_s17, 8  ;;  %p1068_p1 = scmp.lt.s32.totalorder %s1062_s17, %s1437_s9 }
 0x39d   : > { %p1064_p12 = scmp.ne.s32.totalorder %s1062_s17, %s1063_s19  ;;  %p1069_p2 = scmp.lt.s32.totalorder %s1067_s0, %s1063_s19 }
 0x39f   : > { %p1065_p13 = pnand %p1064_p12, %p1214_p5  ;;  %p1070_p3 = por %p1069_p2, %p1068_p1 }
 0x3a1   : > { %p1066_p0 = pneg %p1065_p13 }
 0x3a3   : > { %p1071_p4 = pnand %p1070_p3, %p1066_p0 }
 0x3a5   : > { %1074 = shalt.err (!%p1071_p4)
}
 0x3a6   : > { %937 = dma.vmem_to_hbm [thread:$0]  (%p1214_p5), %s841_s24, 128, %s843_s11, %s828_s12  }
 0x3a7 PF: > { %p949_p7 = scmp.ge.s32.totalorder %s1115_s16, 2  ;;  %s854_s10 = sand.u32 1, %s1103_s13  }
 0x3a8   : > { %s855_s25 = scalar_lea.sflag [#allocation8], %s854_s10 }
 0x3a9   : > { %p944_p8 = pnand %p949_p7, %p1218_p6 }
 0x3ab   : > { %p945_p9 = pneg %p944_p8 }
 0x3ad   : > { %1098 = dma.done.wait (%p945_p9), %s855_s25, 128  }
 0x3ae   : > { %1100 = vsyncadd (%p945_p9), %s855_s25, 4294967168  ;;  %p28_p10 = scmp.ge.s32.totalorder %s1201_s18, 10   ;;  %s1444_s13 = smov %s1107_s14 }
 0x3af   : > { %s1445_s14 = smov %s1111_s15  ;;  %s1446_s15 = smov %s1212_s21 }
 0x3b0   : > { %s1447_s16 = smov %s1201_s18  ;;  %30 = sbr.rel (!%p28_p10) target bundleno = 10 (0xa), region = 108 }
 0x3b5   :  { %861 = vsyncpa [#allocation7], 1 }
 0x3b6   :  { %863 = vsyncpa [#allocation7 + $0x1], 1 }
 0x3b7   :  { %864 = vsyncpa [#allocation8], 1 }
 0x3b8   :  { %866 = vsyncpa [#allocation8 + $0x1], 1 }

</bundles_post_ra>
